<compile_context>
chip_gen: v7x
topology: tpu7x:2x2x1
jax: 0.10.0
libtpu: 0.0.40
codegen_flags: <defaults>
</compile_context>

<pallas_src>
import functools
import math

import jax
import jax.numpy as jnp
import numpy as np
from jax import lax
from jax.experimental import pallas as pl
from jax.experimental.pallas import tpu as pltpu


def _round_up(x, m):
    return ((x + m - 1) // m) * m


def _vmem_limit(per_step_bytes):
    """Scoped VMEM budget derived from the per-step footprint, clamped to the chip."""
    try:
        cap = int(getattr(pltpu.get_tpu_info(), "vmem_capacity_bytes", 64 * 1024 * 1024))
    except Exception:  # pragma: no cover - conservative (v7x-sized) fallback
        cap = 64 * 1024 * 1024
    limit = min(max(32 * 1024 * 1024, 2 * per_step_bytes), (cap * 3) // 4)
    if 2 * per_step_bytes > limit:
        raise ValueError(
            "per-step VMEM footprint (~%.1f MiB) exceeds this chip's budget; "
            "the per-plane design needs halo-DMA plane tiling for this problem size."
            % (per_step_bytes / 2**20))
    return limit


def _pick_depth_block(d, per_depth_bytes, budget=8 * 1024 * 1024):
    """Largest divisor of d whose (double-buffered in+out) footprint fits the budget."""
    td = 1
    for cand in range(1, d + 1):
        if d % cand == 0 and cand * per_depth_bytes <= budget:
            td = cand
    return td


# --------------------------------------------------------------------------------------
# Pass 1: conv (27 taps folded into 3 MXU matmuls) + per-(n, d) partial instance-norm stats
# --------------------------------------------------------------------------------------
def _conv_stats_kernel(x0_ref, x1_ref, x2_ref, w_ref, conv_ref, stats_ref,
                       *, h, w, wp, g, s_out):
    """One (batch, output-depth) grid step.

    x*_ref   : (Cin_p, Lin) bf16 -- flattened padded planes at input depths d, d+1, d+2,
               each stored with a g-wide zero margin on both sides (room for tap shifts).
    w_ref    : (3, Cout, 9*Cin_p) bf16 -- per-depth-tap weight groups.
    conv_ref : (Cout, H, W) f32 -- un-normalized conv output of this depth slice.
    stats_ref: (Cout, 2)    f32 -- per-channel [sum, sum-of-squares] over this slice.
    """
    cout = conv_ref.shape[0]
    acc = jnp.zeros((cout, s_out), jnp.float32)

    # 3 depth taps x 9 in-plane taps.  Each in-plane tap is a static lane-shifted view of
    # the slab; the 9 views are concatenated (sublane-aligned: Cin_p % 16 == 0) into one
    # (9*Cin_p, s_out) VMEM im2col feeding a single MXU matmul per depth tap.
    for a, x_ref in enumerate((x0_ref, x1_ref, x2_ref)):
        pieces = []
        for b in range(3):
            for c in range(3):
                off = g + (b - 1) * wp + (c - 1)        # static offset, margin keeps it in range
                pieces.append(x_ref[:, off:off + s_out])
        im2col = jnp.concatenate(pieces, axis=0)        # (9*Cin_p, s_out) bf16, VMEM-only
        acc = acc + jnp.dot(w_ref[a], im2col, preferred_element_type=jnp.float32)

    # Extract the valid interior rows of the padded plane, store them, and fold the
    # per-channel streaming statistics (sum / sum-of-squares over valid positions only).
    ssum = jnp.zeros((cout, 1), jnp.float32)
    ssq = jnp.zeros((cout, 1), jnp.float32)
    for hh in range(h):
        s0 = (hh + 1) * wp + 1
        row = acc[:, s0:s0 + w]                          # (Cout, W) f32
        conv_ref[:, hh, :] = row
        ssum = ssum + jnp.sum(row, axis=1, keepdims=True)
        ssq = ssq + jnp.sum(row * row, axis=1, keepdims=True)
    stats_ref[...] = jnp.concatenate([ssum, ssq], axis=1)


# --------------------------------------------------------------------------------------
# Pass 2: (x - mean) * rstd -> ReLU (pure elementwise, depth-blocked, lane layout = output)
# --------------------------------------------------------------------------------------
def _norm_relu_kernel(c_ref, mu_ref, rs_ref, o_ref):
    o_ref[...] = jnp.maximum((c_ref[...] - mu_ref[...]) * rs_ref[...], 0.0)


def permute3d_conv_block(x, weight, bias=None, *, eps=1e-5):
    """Forward pass of Permute3DConvBlock.

    x:      (N, Cin, D, H, W) float32 (NCDHW)
    weight: (Cout, Cin, 3, 3, 3)
    bias:   (Cout,) -- accepted for interface fidelity but unused: InstanceNorm3d
                       (affine=False) subtracts the per-(n, c) mean, cancelling it exactly.
    returns (N, Cout, D, H, W)
    """
    n, cin, d, h, w = x.shape
    cout, cin_w, kd, kh, kw = weight.shape
    assert (kd, kh, kw) == (3, 3, 3) and cin_w == cin, "only kernel=3, padding=1, groups=1"
    del bias  # cancelled exactly by the instance-norm mean subtraction

    dp, hp, wp = d + 2, h + 2, w + 2
    g = wp + 1                       # max |flat in-plane tap offset|
    s_out = hp * wp                  # conv evaluated over padded-plane coords; edges discarded
    lin = s_out + 2 * g
    cin_p = _round_up(cin, 16)       # bf16 sublane granule -> aligned concat / contraction
    hw = h * w

    # ---- glue: bf16 FIRST, then pad / transpose / margin-pad (all on the small input) ----
    xb = x.astype(jnp.bfloat16)
    xb = jnp.pad(xb, ((0, 0), (0, cin_p - cin), (1, 1), (1, 1), (1, 1)))   # (N, Cin_p, Dp, Hp, Wp)
    xb = jnp.transpose(xb, (0, 2, 1, 3, 4)).reshape(n, dp, cin_p, s_out)   # depth-major, plane-flat
    xrow = jnp.pad(xb, ((0, 0), (0, 0), (0, 0), (g, g)))                   # (N, Dp, Cin_p, Lin)

    wpad = jnp.pad(weight, ((0, 0), (0, cin_p - cin), (0, 0), (0, 0), (0, 0)))
    wg = jnp.transpose(wpad, (2, 3, 4, 1, 0)).reshape(3, 9 * cin_p, cout)
    wg = jnp.transpose(wg, (0, 2, 1)).astype(jnp.bfloat16)                 # (3, Cout, 9*Cin_p)

    # ---- pass 1: conv + partial stats; grid (batch, depth), both axes parallel ----
    est1 = (2 * 3 * cin_p * lin * 2                       # 3 slabs, double-buffered, bf16
            + 2 * 3 * cout * 9 * cin_p * 2                # folded weights
            + 2 * (cout * hw * 4 + cout * 2 * 4)          # conv + stats out blocks
            + cout * s_out * 4                            # f32 accumulator
            + 2 * 9 * cin_p * s_out * 2                   # in-kernel im2col temporaries
            + 4 * cin_p * lin * 2)                        # slack for shifted-view copies
    conv, stats = pl.pallas_call(
        functools.partial(_conv_stats_kernel, h=h, w=w, wp=wp, g=g, s_out=s_out),
        out_shape=(jax.ShapeDtypeStruct((n, cout, d, h, w), jnp.float32),
                   jax.ShapeDtypeStruct((n, d, cout, 2), jnp.float32)),
        grid=(n, d),
        in_specs=[
            # Same padded-volume buffer passed three times with depth offsets 0/1/2:
            # no HBM duplication is materialized, only a ~3x re-read of the small input.
            pl.BlockSpec((None, None, cin_p, lin), lambda i, j: (i, j, 0, 0)),
            pl.BlockSpec((None, None, cin_p, lin), lambda i, j: (i, j + 1, 0, 0)),
            pl.BlockSpec((None, None, cin_p, lin), lambda i, j: (i, j + 2, 0, 0)),
            pl.BlockSpec((3, cout, 9 * cin_p), lambda i, j: (0, 0, 0)),    # resident weights
        ],
        out_specs=(
            pl.BlockSpec((None, cout, None, h, w), lambda i, j: (i, 0, j, 0, 0)),
            pl.BlockSpec((None, None, cout, 2), lambda i, j: (i, j, 0, 0)),
        ),
        compiler_params=pltpu.CompilerParams(
            dimension_semantics=("parallel", "parallel"),
            vmem_limit_bytes=_vmem_limit(est1),
        ),
    )(xrow, xrow, xrow, wg)

    # ---- tiny stats reduction + normalization coefficients (plain JAX, negligible) ----
    cnt = jnp.float32(d * hw)
    ssum = jnp.sum(stats[..., 0], axis=1)                   # (N, Cout)
    ssq = jnp.sum(stats[..., 1], axis=1)
    mean = ssum / cnt
    var = jnp.maximum(ssq / cnt - mean * mean, 0.0)         # biased variance (PyTorch)
    rstd = lax.rsqrt(var + eps)
    mean5 = mean[:, :, None, None, None]                    # (N, Cout, 1, 1, 1)
    rstd5 = rstd[:, :, None, None, None]

    # ---- pass 2: normalize + ReLU, elementwise, depth-blocked to amortize grid overhead ----
    td = _pick_depth_block(d, per_depth_bytes=4 * cout * hw * 4)
    est2 = 4 * td * cout * hw * 4 + 4 * cout * 4
    out = pl.pallas_call(
        _norm_relu_kernel,
        out_shape=jax.ShapeDtypeStruct((n, cout, d, h, w), jnp.float32),
        grid=(n, d // td),
        in_specs=[
            pl.BlockSpec((None, cout, td, h, w), lambda i, j: (i, 0, j, 0, 0)),
            pl.BlockSpec((None, cout, 1, 1, 1), lambda i, j: (i, 0, 0, 0, 0)),
            pl.BlockSpec((None, cout, 1, 1, 1), lambda i, j: (i, 0, 0, 0, 0)),
        ],
        out_specs=pl.BlockSpec((None, cout, td, h, w), lambda i, j: (i, 0, j, 0, 0)),
        compiler_params=pltpu.CompilerParams(
            dimension_semantics=("parallel", "parallel"),
            vmem_limit_bytes=_vmem_limit(est2),
        ),
    )(conv, mean5, rstd5)

    return out.astype(x.dtype)


def _reference(x, weight, bias, *, eps=1e-5):
    """Pure-JAX f32 reference matching PyTorch Conv3d + InstanceNorm3d(affine=False) + ReLU."""
    dn = lax.conv_dimension_numbers(x.shape, weight.shape, ("NCDHW", "OIDHW", "NCDHW"))
    conv = lax.conv_general_dilated(
        x, weight, window_strides=(1, 1, 1),
        padding=((1, 1), (1, 1), (1, 1)), dimension_numbers=dn,
        precision=lax.Precision.HIGHEST,
    ) + bias[None, :, None, None, None]
    mean = conv.mean(axis=(2, 3, 4), keepdims=True)
    var = ((conv - mean) ** 2).mean(axis=(2, 3, 4), keepdims=True)  # biased var
    return jnp.maximum((conv - mean) * lax.rsqrt(var + eps), 0.0)


if __name__ == "__main__":
    key = jax.random.PRNGKey(0)
    kx, kw_, kb = jax.random.split(key, 3)

    N, Cin, Cout, D, H, W = 2, 4, 8, 8, 8, 8
    x = jax.random.normal(kx, (N, Cin, D, H, W), jnp.float32)

    # Deterministic Conv3d-style init (uniform in +/- 1/sqrt(fan_in)).
    fan_in = Cin * 3 * 3 * 3
    bound = 1.0 / math.sqrt(fan_in)
    weight = jax.random.uniform(kw_, (Cout, Cin, 3, 3, 3), jnp.float32, -bound, bound)
    bias = jax.random.uniform(kb, (Cout,), jnp.float32, -bound, bound)

    fwd = jax.jit(permute3d_conv_block)
    out = jax.block_until_ready(fwd(x, weight, bias))
    assert out.shape == (N, Cout, D, H, W), out.shape

    ref = jax.block_until_ready(_reference(x, weight, bias))
    # bf16 MXU operands (f32 accumulation / f32 stats) -> ~1e-2-scale error on the
    # normalized output; tolerance kept at 3e-2.
    np.testing.assert_allclose(np.asarray(out), np.asarray(ref), rtol=3e-2, atol=3e-2)

    print("KERNEL_OK")
</pallas_src>

<mosaic_0001>
module attributes {stable_mosaic.version = 11 : i64} {
  func.func @_conv_stats_kernel(%arg0: i32, %arg1: i32, %arg2: memref<1x1x16x122xbf16, #tpu.memory_space<vmem>>, %arg3: memref<1x1x16x122xbf16, #tpu.memory_space<vmem>>, %arg4: memref<1x1x16x122xbf16, #tpu.memory_space<vmem>>, %arg5: memref<3x8x144xbf16, #tpu.memory_space<vmem>>, %arg6: memref<1x8x1x8x8xf32, #tpu.memory_space<vmem>>, %arg7: memref<1x1x8x2xf32, #tpu.memory_space<vmem>>) attributes {dimension_semantics = [#tpu.dimension_semantics<parallel>, #tpu.dimension_semantics<parallel>], iteration_bounds = array<i64: 2, 8>, scalar_prefetch = 0 : i64, scratch_operands = 0 : i64, tpu.core_type = #tpu.core_type<tc>, window_params = [{transform_indices = @transform_0, window_bounds = array<i64: 1, 1, 16, 122>}, {transform_indices = @transform_1, window_bounds = array<i64: 1, 1, 16, 122>}, {transform_indices = @transform_2, window_bounds = array<i64: 1, 1, 16, 122>}, {pipeline_mode = #tpu.pipeline_mode<synchronous>, transform_indices = @transform_3, window_bounds = array<i64: 3, 8, 144>}, {transform_indices = @transform_4, window_bounds = array<i64: 1, 8, 1, 8, 8>}, {transform_indices = @transform_5, window_bounds = array<i64: 1, 1, 8, 2>}]} {
    %cst = arith.constant 0.000000e+00 : f32
    %0 = vector.broadcast %cst : f32 to vector<8x100xf32>
    %c0 = arith.constant 0 : index
    %c0_0 = arith.constant 0 : index
    %c0_1 = arith.constant 0 : index
    %c0_2 = arith.constant 0 : index
    %1 = vector.load %arg2[%c0, %c0_0, %c0_1, %c0_2] : memref<1x1x16x122xbf16, #tpu.memory_space<vmem>>, vector<1x1x16x100xbf16>
    %2 = vector.shape_cast %1 : vector<1x1x16x100xbf16> to vector<16x100xbf16>
    %c0_3 = arith.constant 0 : index
    %c0_4 = arith.constant 0 : index
    %c0_5 = arith.constant 0 : index
    %c1 = arith.constant 1 : index
    %3 = vector.load %arg2[%c0_3, %c0_4, %c0_5, %c1] : memref<1x1x16x122xbf16, #tpu.memory_space<vmem>>, vector<1x1x16x100xbf16>
    %4 = vector.shape_cast %3 : vector<1x1x16x100xbf16> to vector<16x100xbf16>
    %c0_6 = arith.constant 0 : index
    %c0_7 = arith.constant 0 : index
    %c0_8 = arith.constant 0 : index
    %c2 = arith.constant 2 : index
    %5 = vector.load %arg2[%c0_6, %c0_7, %c0_8, %c2] : memref<1x1x16x122xbf16, #tpu.memory_space<vmem>>, vector<1x1x16x100xbf16>
    %6 = vector.shape_cast %5 : vector<1x1x16x100xbf16> to vector<16x100xbf16>
    %c0_9 = arith.constant 0 : index
    %c0_10 = arith.constant 0 : index
    %c0_11 = arith.constant 0 : index
    %c10 = arith.constant 10 : index
    %7 = vector.load %arg2[%c0_9, %c0_10, %c0_11, %c10] : memref<1x1x16x122xbf16, #tpu.memory_space<vmem>>, vector<1x1x16x100xbf16>
    %8 = vector.shape_cast %7 : vector<1x1x16x100xbf16> to vector<16x100xbf16>
    %c0_12 = arith.constant 0 : index
    %c0_13 = arith.constant 0 : index
    %c0_14 = arith.constant 0 : index
    %c11 = arith.constant 11 : index
    %9 = vector.load %arg2[%c0_12, %c0_13, %c0_14, %c11] : memref<1x1x16x122xbf16, #tpu.memory_space<vmem>>, vector<1x1x16x100xbf16>
    %10 = vector.shape_cast %9 : vector<1x1x16x100xbf16> to vector<16x100xbf16>
    %c0_15 = arith.constant 0 : index
    %c0_16 = arith.constant 0 : index
    %c0_17 = arith.constant 0 : index
    %c12 = arith.constant 12 : index
    %11 = vector.load %arg2[%c0_15, %c0_16, %c0_17, %c12] : memref<1x1x16x122xbf16, #tpu.memory_space<vmem>>, vector<1x1x16x100xbf16>
    %12 = vector.shape_cast %11 : vector<1x1x16x100xbf16> to vector<16x100xbf16>
    %c0_18 = arith.constant 0 : index
    %c0_19 = arith.constant 0 : index
    %c0_20 = arith.constant 0 : index
    %c20 = arith.constant 20 : index
    %13 = vector.load %arg2[%c0_18, %c0_19, %c0_20, %c20] : memref<1x1x16x122xbf16, #tpu.memory_space<vmem>>, vector<1x1x16x100xbf16>
    %14 = vector.shape_cast %13 : vector<1x1x16x100xbf16> to vector<16x100xbf16>
    %c0_21 = arith.constant 0 : index
    %c0_22 = arith.constant 0 : index
    %c0_23 = arith.constant 0 : index
    %c21 = arith.constant 21 : index
    %15 = vector.load %arg2[%c0_21, %c0_22, %c0_23, %c21] : memref<1x1x16x122xbf16, #tpu.memory_space<vmem>>, vector<1x1x16x100xbf16>
    %16 = vector.shape_cast %15 : vector<1x1x16x100xbf16> to vector<16x100xbf16>
    %c0_24 = arith.constant 0 : index
    %c0_25 = arith.constant 0 : index
    %c0_26 = arith.constant 0 : index
    %c22 = arith.constant 22 : index
    %17 = vector.load %arg2[%c0_24, %c0_25, %c0_26, %c22] : memref<1x1x16x122xbf16, #tpu.memory_space<vmem>>, vector<1x1x16x100xbf16>
    %18 = vector.shape_cast %17 : vector<1x1x16x100xbf16> to vector<16x100xbf16>
    %19 = tpu.concatenate %2, %4, %6, %8, %10, %12, %14, %16, %18 in 0 : vector<16x100xbf16>, vector<16x100xbf16>, vector<16x100xbf16>, vector<16x100xbf16>, vector<16x100xbf16>, vector<16x100xbf16>, vector<16x100xbf16>, vector<16x100xbf16>, vector<16x100xbf16> -> vector<144x100xbf16>
    %c0_27 = arith.constant 0 : index
    %c0_28 = arith.constant 0 : index
    %c0_29 = arith.constant 0 : index
    %20 = vector.load %arg5[%c0_27, %c0_28, %c0_29] : memref<3x8x144xbf16, #tpu.memory_space<vmem>>, vector<1x8x144xbf16>
    %21 = vector.shape_cast %20 : vector<1x8x144xbf16> to vector<8x144xbf16>
    %cst_30 = arith.constant dense<0.000000e+00> : vector<8x100xf32>
    %22 = tpu.matmul %21, %19, %cst_30 {dimension_numbers = #tpu.dot_dimension_numbers<[1], [0], [0], [1], [0, 0, 1, 1], [], []>} : vector<8x144xbf16>, vector<144x100xbf16>, vector<8x100xf32> -> vector<8x100xf32>
    %23 = arith.addf %0, %22 : vector<8x100xf32>
    %c0_31 = arith.constant 0 : index
    %c0_32 = arith.constant 0 : index
    %c0_33 = arith.constant 0 : index
    %c0_34 = arith.constant 0 : index
    %24 = vector.load %arg3[%c0_31, %c0_32, %c0_33, %c0_34] : memref<1x1x16x122xbf16, #tpu.memory_space<vmem>>, vector<1x1x16x100xbf16>
    %25 = vector.shape_cast %24 : vector<1x1x16x100xbf16> to vector<16x100xbf16>
    %c0_35 = arith.constant 0 : index
    %c0_36 = arith.constant 0 : index
    %c0_37 = arith.constant 0 : index
    %c1_38 = arith.constant 1 : index
    %26 = vector.load %arg3[%c0_35, %c0_36, %c0_37, %c1_38] : memref<1x1x16x122xbf16, #tpu.memory_space<vmem>>, vector<1x1x16x100xbf16>
    %27 = vector.shape_cast %26 : vector<1x1x16x100xbf16> to vector<16x100xbf16>
    %c0_39 = arith.constant 0 : index
    %c0_40 = arith.constant 0 : index
    %c0_41 = arith.constant 0 : index
    %c2_42 = arith.constant 2 : index
    %28 = vector.load %arg3[%c0_39, %c0_40, %c0_41, %c2_42] : memref<1x1x16x122xbf16, #tpu.memory_space<vmem>>, vector<1x1x16x100xbf16>
    %29 = vector.shape_cast %28 : vector<1x1x16x100xbf16> to vector<16x100xbf16>
    %c0_43 = arith.constant 0 : index
    %c0_44 = arith.constant 0 : index
    %c0_45 = arith.constant 0 : index
    %c10_46 = arith.constant 10 : index
    %30 = vector.load %arg3[%c0_43, %c0_44, %c0_45, %c10_46] : memref<1x1x16x122xbf16, #tpu.memory_space<vmem>>, vector<1x1x16x100xbf16>
    %31 = vector.shape_cast %30 : vector<1x1x16x100xbf16> to vector<16x100xbf16>
    %c0_47 = arith.constant 0 : index
    %c0_48 = arith.constant 0 : index
    %c0_49 = arith.constant 0 : index
    %c11_50 = arith.constant 11 : index
    %32 = vector.load %arg3[%c0_47, %c0_48, %c0_49, %c11_50] : memref<1x1x16x122xbf16, #tpu.memory_space<vmem>>, vector<1x1x16x100xbf16>
    %33 = vector.shape_cast %32 : vector<1x1x16x100xbf16> to vector<16x100xbf16>
    %c0_51 = arith.constant 0 : index
    %c0_52 = arith.constant 0 : index
    %c0_53 = arith.constant 0 : index
    %c12_54 = arith.constant 12 : index
    %34 = vector.load %arg3[%c0_51, %c0_52, %c0_53, %c12_54] : memref<1x1x16x122xbf16, #tpu.memory_space<vmem>>, vector<1x1x16x100xbf16>
    %35 = vector.shape_cast %34 : vector<1x1x16x100xbf16> to vector<16x100xbf16>
    %c0_55 = arith.constant 0 : index
    %c0_56 = arith.constant 0 : index
    %c0_57 = arith.constant 0 : index
    %c20_58 = arith.constant 20 : index
    %36 = vector.load %arg3[%c0_55, %c0_56, %c0_57, %c20_58] : memref<1x1x16x122xbf16, #tpu.memory_space<vmem>>, vector<1x1x16x100xbf16>
    %37 = vector.shape_cast %36 : vector<1x1x16x100xbf16> to vector<16x100xbf16>
    %c0_59 = arith.constant 0 : index
    %c0_60 = arith.constant 0 : index
    %c0_61 = arith.constant 0 : index
    %c21_62 = arith.constant 21 : index
    %38 = vector.load %arg3[%c0_59, %c0_60, %c0_61, %c21_62] : memref<1x1x16x122xbf16, #tpu.memory_space<vmem>>, vector<1x1x16x100xbf16>
    %39 = vector.shape_cast %38 : vector<1x1x16x100xbf16> to vector<16x100xbf16>
    %c0_63 = arith.constant 0 : index
    %c0_64 = arith.constant 0 : index
    %c0_65 = arith.constant 0 : index
    %c22_66 = arith.constant 22 : index
    %40 = vector.load %arg3[%c0_63, %c0_64, %c0_65, %c22_66] : memref<1x1x16x122xbf16, #tpu.memory_space<vmem>>, vector<1x1x16x100xbf16>
    %41 = vector.shape_cast %40 : vector<1x1x16x100xbf16> to vector<16x100xbf16>
    %42 = tpu.concatenate %25, %27, %29, %31, %33, %35, %37, %39, %41 in 0 : vector<16x100xbf16>, vector<16x100xbf16>, vector<16x100xbf16>, vector<16x100xbf16>, vector<16x100xbf16>, vector<16x100xbf16>, vector<16x100xbf16>, vector<16x100xbf16>, vector<16x100xbf16> -> vector<144x100xbf16>
    %c1_67 = arith.constant 1 : index
    %c0_68 = arith.constant 0 : index
    %c0_69 = arith.constant 0 : index
    %43 = vector.load %arg5[%c1_67, %c0_68, %c0_69] : memref<3x8x144xbf16, #tpu.memory_space<vmem>>, vector<1x8x144xbf16>
    %44 = vector.shape_cast %43 : vector<1x8x144xbf16> to vector<8x144xbf16>
    %cst_70 = arith.constant dense<0.000000e+00> : vector<8x100xf32>
    %45 = tpu.matmul %44, %42, %cst_70 {dimension_numbers = #tpu.dot_dimension_numbers<[1], [0], [0], [1], [0, 0, 1, 1], [], []>} : vector<8x144xbf16>, vector<144x100xbf16>, vector<8x100xf32> -> vector<8x100xf32>
    %46 = arith.addf %23, %45 : vector<8x100xf32>
    %c0_71 = arith.constant 0 : index
    %c0_72 = arith.constant 0 : index
    %c0_73 = arith.constant 0 : index
    %c0_74 = arith.constant 0 : index
    %47 = vector.load %arg4[%c0_71, %c0_72, %c0_73, %c0_74] : memref<1x1x16x122xbf16, #tpu.memory_space<vmem>>, vector<1x1x16x100xbf16>
    %48 = vector.shape_cast %47 : vector<1x1x16x100xbf16> to vector<16x100xbf16>
    %c0_75 = arith.constant 0 : index
    %c0_76 = arith.constant 0 : index
    %c0_77 = arith.constant 0 : index
    %c1_78 = arith.constant 1 : index
    %49 = vector.load %arg4[%c0_75, %c0_76, %c0_77, %c1_78] : memref<1x1x16x122xbf16, #tpu.memory_space<vmem>>, vector<1x1x16x100xbf16>
    %50 = vector.shape_cast %49 : vector<1x1x16x100xbf16> to vector<16x100xbf16>
    %c0_79 = arith.constant 0 : index
    %c0_80 = arith.constant 0 : index
    %c0_81 = arith.constant 0 : index
    %c2_82 = arith.constant 2 : index
    %51 = vector.load %arg4[%c0_79, %c0_80, %c0_81, %c2_82] : memref<1x1x16x122xbf16, #tpu.memory_space<vmem>>, vector<1x1x16x100xbf16>
    %52 = vector.shape_cast %51 : vector<1x1x16x100xbf16> to vector<16x100xbf16>
    %c0_83 = arith.constant 0 : index
    %c0_84 = arith.constant 0 : index
    %c0_85 = arith.constant 0 : index
    %c10_86 = arith.constant 10 : index
    %53 = vector.load %arg4[%c0_83, %c0_84, %c0_85, %c10_86] : memref<1x1x16x122xbf16, #tpu.memory_space<vmem>>, vector<1x1x16x100xbf16>
    %54 = vector.shape_cast %53 : vector<1x1x16x100xbf16> to vector<16x100xbf16>
    %c0_87 = arith.constant 0 : index
    %c0_88 = arith.constant 0 : index
    %c0_89 = arith.constant 0 : index
    %c11_90 = arith.constant 11 : index
    %55 = vector.load %arg4[%c0_87, %c0_88, %c0_89, %c11_90] : memref<1x1x16x122xbf16, #tpu.memory_space<vmem>>, vector<1x1x16x100xbf16>
    %56 = vector.shape_cast %55 : vector<1x1x16x100xbf16> to vector<16x100xbf16>
    %c0_91 = arith.constant 0 : index
    %c0_92 = arith.constant 0 : index
    %c0_93 = arith.constant 0 : index
    %c12_94 = arith.constant 12 : index
    %57 = vector.load %arg4[%c0_91, %c0_92, %c0_93, %c12_94] : memref<1x1x16x122xbf16, #tpu.memory_space<vmem>>, vector<1x1x16x100xbf16>
    %58 = vector.shape_cast %57 : vector<1x1x16x100xbf16> to vector<16x100xbf16>
    %c0_95 = arith.constant 0 : index
    %c0_96 = arith.constant 0 : index
    %c0_97 = arith.constant 0 : index
    %c20_98 = arith.constant 20 : index
    %59 = vector.load %arg4[%c0_95, %c0_96, %c0_97, %c20_98] : memref<1x1x16x122xbf16, #tpu.memory_space<vmem>>, vector<1x1x16x100xbf16>
    %60 = vector.shape_cast %59 : vector<1x1x16x100xbf16> to vector<16x100xbf16>
    %c0_99 = arith.constant 0 : index
    %c0_100 = arith.constant 0 : index
    %c0_101 = arith.constant 0 : index
    %c21_102 = arith.constant 21 : index
    %61 = vector.load %arg4[%c0_99, %c0_100, %c0_101, %c21_102] : memref<1x1x16x122xbf16, #tpu.memory_space<vmem>>, vector<1x1x16x100xbf16>
    %62 = vector.shape_cast %61 : vector<1x1x16x100xbf16> to vector<16x100xbf16>
    %c0_103 = arith.constant 0 : index
    %c0_104 = arith.constant 0 : index
    %c0_105 = arith.constant 0 : index
    %c22_106 = arith.constant 22 : index
    %63 = vector.load %arg4[%c0_103, %c0_104, %c0_105, %c22_106] : memref<1x1x16x122xbf16, #tpu.memory_space<vmem>>, vector<1x1x16x100xbf16>
    %64 = vector.shape_cast %63 : vector<1x1x16x100xbf16> to vector<16x100xbf16>
    %65 = tpu.concatenate %48, %50, %52, %54, %56, %58, %60, %62, %64 in 0 : vector<16x100xbf16>, vector<16x100xbf16>, vector<16x100xbf16>, vector<16x100xbf16>, vector<16x100xbf16>, vector<16x100xbf16>, vector<16x100xbf16>, vector<16x100xbf16>, vector<16x100xbf16> -> vector<144x100xbf16>
    %c2_107 = arith.constant 2 : index
    %c0_108 = arith.constant 0 : index
    %c0_109 = arith.constant 0 : index
    %66 = vector.load %arg5[%c2_107, %c0_108, %c0_109] : memref<3x8x144xbf16, #tpu.memory_space<vmem>>, vector<1x8x144xbf16>
    %67 = vector.shape_cast %66 : vector<1x8x144xbf16> to vector<8x144xbf16>
    %cst_110 = arith.constant dense<0.000000e+00> : vector<8x100xf32>
    %68 = tpu.matmul %67, %65, %cst_110 {dimension_numbers = #tpu.dot_dimension_numbers<[1], [0], [0], [1], [0, 0, 1, 1], [], []>} : vector<8x144xbf16>, vector<144x100xbf16>, vector<8x100xf32> -> vector<8x100xf32>
    %69 = arith.addf %46, %68 : vector<8x100xf32>
    %cst_111 = arith.constant 0.000000e+00 : f32
    %70 = vector.broadcast %cst_111 : f32 to vector<8x1xf32>
    %cst_112 = arith.constant 0.000000e+00 : f32
    %71 = vector.broadcast %cst_112 : f32 to vector<8x1xf32>
    %72 = vector.extract_strided_slice %69 {offsets = [0, 11], sizes = [8, 8], strides = [1, 1]} : vector<8x100xf32> to vector<8x8xf32>
    %c0_113 = arith.constant 0 : index
    %c0_114 = arith.constant 0 : index
    %c0_115 = arith.constant 0 : index
    %c0_116 = arith.constant 0 : index
    %c0_117 = arith.constant 0 : index
    %73 = vector.load %arg6[%c0_113, %c0_114, %c0_115, %c0_116, %c0_117] : memref<1x8x1x8x8xf32, #tpu.memory_space<vmem>>, vector<1x8x1x1x8xf32>
    %74 = vector.shape_cast %73 : vector<1x8x1x1x8xf32> to vector<8x8xf32>
    %75 = vector.shape_cast %72 : vector<8x8xf32> to vector<1x8x1x1x8xf32>
    tpu.vector_store %arg6[%c0_113, %c0_114, %c0_115, %c0_116, %c0_117], %75 {strides = array<i32>} : memref<1x8x1x8x8xf32, #tpu.memory_space<vmem>>, vector<1x8x1x1x8xf32>,
    %cst_118 = arith.constant dense<0.000000e+00> : vector<8xf32>
    %76 = vector.multi_reduction <add>, %72, %cst_118 [1] : vector<8x8xf32> to vector<8xf32>
    %77 = vector.shape_cast %76 : vector<8xf32> to vector<8x1xf32>
    %78 = arith.addf %70, %77 : vector<8x1xf32>
    %79 = arith.mulf %72, %72 : vector<8x8xf32>
    %cst_119 = arith.constant dense<0.000000e+00> : vector<8xf32>
    %80 = vector.multi_reduction <add>, %79, %cst_119 [1] : vector<8x8xf32> to vector<8xf32>
    %81 = vector.shape_cast %80 : vector<8xf32> to vector<8x1xf32>
    %82 = arith.addf %71, %81 : vector<8x1xf32>
    %83 = vector.extract_strided_slice %69 {offsets = [0, 21], sizes = [8, 8], strides = [1, 1]} : vector<8x100xf32> to vector<8x8xf32>
    %c0_120 = arith.constant 0 : index
    %c0_121 = arith.constant 0 : index
    %c0_122 = arith.constant 0 : index
    %c1_123 = arith.constant 1 : index
    %c0_124 = arith.constant 0 : index
    %84 = vector.load %arg6[%c0_120, %c0_121, %c0_122, %c1_123, %c0_124] : memref<1x8x1x8x8xf32, #tpu.memory_space<vmem>>, vector<1x8x1x1x8xf32>
    %85 = vector.shape_cast %84 : vector<1x8x1x1x8xf32> to vector<8x8xf32>
    %86 = vector.shape_cast %83 : vector<8x8xf32> to vector<1x8x1x1x8xf32>
    tpu.vector_store %arg6[%c0_120, %c0_121, %c0_122, %c1_123, %c0_124], %86 {strides = array<i32>} : memref<1x8x1x8x8xf32, #tpu.memory_space<vmem>>, vector<1x8x1x1x8xf32>,
    %cst_125 = arith.constant dense<0.000000e+00> : vector<8xf32>
    %87 = vector.multi_reduction <add>, %83, %cst_125 [1] : vector<8x8xf32> to vector<8xf32>
    %88 = vector.shape_cast %87 : vector<8xf32> to vector<8x1xf32>
    %89 = arith.addf %78, %88 : vector<8x1xf32>
    %90 = arith.mulf %83, %83 : vector<8x8xf32>
    %cst_126 = arith.constant dense<0.000000e+00> : vector<8xf32>
    %91 = vector.multi_reduction <add>, %90, %cst_126 [1] : vector<8x8xf32> to vector<8xf32>
    %92 = vector.shape_cast %91 : vector<8xf32> to vector<8x1xf32>
    %93 = arith.addf %82, %92 : vector<8x1xf32>
    %94 = vector.extract_strided_slice %69 {offsets = [0, 31], sizes = [8, 8], strides = [1, 1]} : vector<8x100xf32> to vector<8x8xf32>
    %c0_127 = arith.constant 0 : index
    %c0_128 = arith.constant 0 : index
    %c0_129 = arith.constant 0 : index
    %c2_130 = arith.constant 2 : index
    %c0_131 = arith.constant 0 : index
    %95 = vector.load %arg6[%c0_127, %c0_128, %c0_129, %c2_130, %c0_131] : memref<1x8x1x8x8xf32, #tpu.memory_space<vmem>>, vector<1x8x1x1x8xf32>
    %96 = vector.shape_cast %95 : vector<1x8x1x1x8xf32> to vector<8x8xf32>
    %97 = vector.shape_cast %94 : vector<8x8xf32> to vector<1x8x1x1x8xf32>
    tpu.vector_store %arg6[%c0_127, %c0_128, %c0_129, %c2_130, %c0_131], %97 {strides = array<i32>} : memref<1x8x1x8x8xf32, #tpu.memory_space<vmem>>, vector<1x8x1x1x8xf32>,
    %cst_132 = arith.constant dense<0.000000e+00> : vector<8xf32>
    %98 = vector.multi_reduction <add>, %94, %cst_132 [1] : vector<8x8xf32> to vector<8xf32>
    %99 = vector.shape_cast %98 : vector<8xf32> to vector<8x1xf32>
    %100 = arith.addf %89, %99 : vector<8x1xf32>
    %101 = arith.mulf %94, %94 : vector<8x8xf32>
    %cst_133 = arith.constant dense<0.000000e+00> : vector<8xf32>
    %102 = vector.multi_reduction <add>, %101, %cst_133 [1] : vector<8x8xf32> to vector<8xf32>
    %103 = vector.shape_cast %102 : vector<8xf32> to vector<8x1xf32>
    %104 = arith.addf %93, %103 : vector<8x1xf32>
    %105 = vector.extract_strided_slice %69 {offsets = [0, 41], sizes = [8, 8], strides = [1, 1]} : vector<8x100xf32> to vector<8x8xf32>
    %c0_134 = arith.constant 0 : index
    %c0_135 = arith.constant 0 : index
    %c0_136 = arith.constant 0 : index
    %c3 = arith.constant 3 : index
    %c0_137 = arith.constant 0 : index
    %106 = vector.load %arg6[%c0_134, %c0_135, %c0_136, %c3, %c0_137] : memref<1x8x1x8x8xf32, #tpu.memory_space<vmem>>, vector<1x8x1x1x8xf32>
    %107 = vector.shape_cast %106 : vector<1x8x1x1x8xf32> to vector<8x8xf32>
    %108 = vector.shape_cast %105 : vector<8x8xf32> to vector<1x8x1x1x8xf32>
    tpu.vector_store %arg6[%c0_134, %c0_135, %c0_136, %c3, %c0_137], %108 {strides = array<i32>} : memref<1x8x1x8x8xf32, #tpu.memory_space<vmem>>, vector<1x8x1x1x8xf32>,
    %cst_138 = arith.constant dense<0.000000e+00> : vector<8xf32>
    %109 = vector.multi_reduction <add>, %105, %cst_138 [1] : vector<8x8xf32> to vector<8xf32>
    %110 = vector.shape_cast %109 : vector<8xf32> to vector<8x1xf32>
    %111 = arith.addf %100, %110 : vector<8x1xf32>
    %112 = arith.mulf %105, %105 : vector<8x8xf32>
    %cst_139 = arith.constant dense<0.000000e+00> : vector<8xf32>
    %113 = vector.multi_reduction <add>, %112, %cst_139 [1] : vector<8x8xf32> to vector<8xf32>
    %114 = vector.shape_cast %113 : vector<8xf32> to vector<8x1xf32>
    %115 = arith.addf %104, %114 : vector<8x1xf32>
    %116 = vector.extract_strided_slice %69 {offsets = [0, 51], sizes = [8, 8], strides = [1, 1]} : vector<8x100xf32> to vector<8x8xf32>
    %c0_140 = arith.constant 0 : index
    %c0_141 = arith.constant 0 : index
    %c0_142 = arith.constant 0 : index
    %c4 = arith.constant 4 : index
    %c0_143 = arith.constant 0 : index
    %117 = vector.load %arg6[%c0_140, %c0_141, %c0_142, %c4, %c0_143] : memref<1x8x1x8x8xf32, #tpu.memory_space<vmem>>, vector<1x8x1x1x8xf32>
    %118 = vector.shape_cast %117 : vector<1x8x1x1x8xf32> to vector<8x8xf32>
    %119 = vector.shape_cast %116 : vector<8x8xf32> to vector<1x8x1x1x8xf32>
    tpu.vector_store %arg6[%c0_140, %c0_141, %c0_142, %c4, %c0_143], %119 {strides = array<i32>} : memref<1x8x1x8x8xf32, #tpu.memory_space<vmem>>, vector<1x8x1x1x8xf32>,
    %cst_144 = arith.constant dense<0.000000e+00> : vector<8xf32>
    %120 = vector.multi_reduction <add>, %116, %cst_144 [1] : vector<8x8xf32> to vector<8xf32>
    %121 = vector.shape_cast %120 : vector<8xf32> to vector<8x1xf32>
    %122 = arith.addf %111, %121 : vector<8x1xf32>
    %123 = arith.mulf %116, %116 : vector<8x8xf32>
    %cst_145 = arith.constant dense<0.000000e+00> : vector<8xf32>
    %124 = vector.multi_reduction <add>, %123, %cst_145 [1] : vector<8x8xf32> to vector<8xf32>
    %125 = vector.shape_cast %124 : vector<8xf32> to vector<8x1xf32>
    %126 = arith.addf %115, %125 : vector<8x1xf32>
    %127 = vector.extract_strided_slice %69 {offsets = [0, 61], sizes = [8, 8], strides = [1, 1]} : vector<8x100xf32> to vector<8x8xf32>
    %c0_146 = arith.constant 0 : index
    %c0_147 = arith.constant 0 : index
    %c0_148 = arith.constant 0 : index
    %c5 = arith.constant 5 : index
    %c0_149 = arith.constant 0 : index
    %128 = vector.load %arg6[%c0_146, %c0_147, %c0_148, %c5, %c0_149] : memref<1x8x1x8x8xf32, #tpu.memory_space<vmem>>, vector<1x8x1x1x8xf32>
    %129 = vector.shape_cast %128 : vector<1x8x1x1x8xf32> to vector<8x8xf32>
    %130 = vector.shape_cast %127 : vector<8x8xf32> to vector<1x8x1x1x8xf32>
    tpu.vector_store %arg6[%c0_146, %c0_147, %c0_148, %c5, %c0_149], %130 {strides = array<i32>} : memref<1x8x1x8x8xf32, #tpu.memory_space<vmem>>, vector<1x8x1x1x8xf32>,
    %cst_150 = arith.constant dense<0.000000e+00> : vector<8xf32>
    %131 = vector.multi_reduction <add>, %127, %cst_150 [1] : vector<8x8xf32> to vector<8xf32>
    %132 = vector.shape_cast %131 : vector<8xf32> to vector<8x1xf32>
    %133 = arith.addf %122, %132 : vector<8x1xf32>
    %134 = arith.mulf %127, %127 : vector<8x8xf32>
    %cst_151 = arith.constant dense<0.000000e+00> : vector<8xf32>
    %135 = vector.multi_reduction <add>, %134, %cst_151 [1] : vector<8x8xf32> to vector<8xf32>
    %136 = vector.shape_cast %135 : vector<8xf32> to vector<8x1xf32>
    %137 = arith.addf %126, %136 : vector<8x1xf32>
    %138 = vector.extract_strided_slice %69 {offsets = [0, 71], sizes = [8, 8], strides = [1, 1]} : vector<8x100xf32> to vector<8x8xf32>
    %c0_152 = arith.constant 0 : index
    %c0_153 = arith.constant 0 : index
    %c0_154 = arith.constant 0 : index
    %c6 = arith.constant 6 : index
    %c0_155 = arith.constant 0 : index
    %139 = vector.load %arg6[%c0_152, %c0_153, %c0_154, %c6, %c0_155] : memref<1x8x1x8x8xf32, #tpu.memory_space<vmem>>, vector<1x8x1x1x8xf32>
    %140 = vector.shape_cast %139 : vector<1x8x1x1x8xf32> to vector<8x8xf32>
    %141 = vector.shape_cast %138 : vector<8x8xf32> to vector<1x8x1x1x8xf32>
    tpu.vector_store %arg6[%c0_152, %c0_153, %c0_154, %c6, %c0_155], %141 {strides = array<i32>} : memref<1x8x1x8x8xf32, #tpu.memory_space<vmem>>, vector<1x8x1x1x8xf32>,
    %cst_156 = arith.constant dense<0.000000e+00> : vector<8xf32>
    %142 = vector.multi_reduction <add>, %138, %cst_156 [1] : vector<8x8xf32> to vector<8xf32>
    %143 = vector.shape_cast %142 : vector<8xf32> to vector<8x1xf32>
    %144 = arith.addf %133, %143 : vector<8x1xf32>
    %145 = arith.mulf %138, %138 : vector<8x8xf32>
    %cst_157 = arith.constant dense<0.000000e+00> : vector<8xf32>
    %146 = vector.multi_reduction <add>, %145, %cst_157 [1] : vector<8x8xf32> to vector<8xf32>
    %147 = vector.shape_cast %146 : vector<8xf32> to vector<8x1xf32>
    %148 = arith.addf %137, %147 : vector<8x1xf32>
    %149 = vector.extract_strided_slice %69 {offsets = [0, 81], sizes = [8, 8], strides = [1, 1]} : vector<8x100xf32> to vector<8x8xf32>
    %c0_158 = arith.constant 0 : index
    %c0_159 = arith.constant 0 : index
    %c0_160 = arith.constant 0 : index
    %c7 = arith.constant 7 : index
    %c0_161 = arith.constant 0 : index
    %150 = vector.load %arg6[%c0_158, %c0_159, %c0_160, %c7, %c0_161] : memref<1x8x1x8x8xf32, #tpu.memory_space<vmem>>, vector<1x8x1x1x8xf32>
    %151 = vector.shape_cast %150 : vector<1x8x1x1x8xf32> to vector<8x8xf32>
    %152 = vector.shape_cast %149 : vector<8x8xf32> to vector<1x8x1x1x8xf32>
    tpu.vector_store %arg6[%c0_158, %c0_159, %c0_160, %c7, %c0_161], %152 {strides = array<i32>} : memref<1x8x1x8x8xf32, #tpu.memory_space<vmem>>, vector<1x8x1x1x8xf32>,
    %cst_162 = arith.constant dense<0.000000e+00> : vector<8xf32>
    %153 = vector.multi_reduction <add>, %149, %cst_162 [1] : vector<8x8xf32> to vector<8xf32>
    %154 = vector.shape_cast %153 : vector<8xf32> to vector<8x1xf32>
    %155 = arith.addf %144, %154 : vector<8x1xf32>
    %156 = arith.mulf %149, %149 : vector<8x8xf32>
    %cst_163 = arith.constant dense<0.000000e+00> : vector<8xf32>
    %157 = vector.multi_reduction <add>, %156, %cst_163 [1] : vector<8x8xf32> to vector<8xf32>
    %158 = vector.shape_cast %157 : vector<8xf32> to vector<8x1xf32>
    %159 = arith.addf %148, %158 : vector<8x1xf32>
    %160 = tpu.concatenate %155, %159 in 1 : vector<8x1xf32>, vector<8x1xf32> -> vector<8x2xf32>
    %c0_164 = arith.constant 0 : index
    %c0_165 = arith.constant 0 : index
    %c0_166 = arith.constant 0 : index
    %c0_167 = arith.constant 0 : index
    %161 = vector.load %arg7[%c0_164, %c0_165, %c0_166, %c0_167] : memref<1x1x8x2xf32, #tpu.memory_space<vmem>>, vector<1x1x8x2xf32>
    %162 = vector.shape_cast %161 : vector<1x1x8x2xf32> to vector<8x2xf32>
    %163 = vector.shape_cast %160 : vector<8x2xf32> to vector<1x1x8x2xf32>
    tpu.vector_store %arg7[%c0_164, %c0_165, %c0_166, %c0_167], %163 {strides = array<i32>} : memref<1x1x8x2xf32, #tpu.memory_space<vmem>>, vector<1x1x8x2xf32>,
    return
  }
  func.func @transform_0(%arg0: i32, %arg1: i32) -> (i32, i32, i32, i32) {
    %c0_i32 = arith.constant 0 : i32
    %c0_i32_0 = arith.constant 0 : i32
    %c0_i32_1 = arith.constant 0 : i32
    return %arg0, %arg1, %c0_i32, %c0_i32_0 : i32, i32, i32, i32
  }
  func.func @transform_1(%arg0: i32, %arg1: i32) -> (i32, i32, i32, i32) {
    %c1_i32 = arith.constant 1 : i32
    %0 = arith.addi %arg1, %c1_i32 : i32
    %c0_i32 = arith.constant 0 : i32
    %c0_i32_0 = arith.constant 0 : i32
    %c0_i32_1 = arith.constant 0 : i32
    return %arg0, %0, %c0_i32, %c0_i32_0 : i32, i32, i32, i32
  }
  func.func @transform_2(%arg0: i32, %arg1: i32) -> (i32, i32, i32, i32) {
    %c2_i32 = arith.constant 2 : i32
    %0 = arith.addi %arg1, %c2_i32 : i32
    %c0_i32 = arith.constant 0 : i32
    %c0_i32_0 = arith.constant 0 : i32
    %c0_i32_1 = arith.constant 0 : i32
    return %arg0, %0, %c0_i32, %c0_i32_0 : i32, i32, i32, i32
  }
  func.func @transform_3(%arg0: i32, %arg1: i32) -> (i32, i32, i32) {
    %c0_i32 = arith.constant 0 : i32
    %c0_i32_0 = arith.constant 0 : i32
    %c0_i32_1 = arith.constant 0 : i32
    %c0_i32_2 = arith.constant 0 : i32
    return %c0_i32, %c0_i32_0, %c0_i32_1 : i32, i32, i32
  }
  func.func @transform_4(%arg0: i32, %arg1: i32) -> (i32, i32, i32, i32, i32) {
    %c0_i32 = arith.constant 0 : i32
    %c0_i32_0 = arith.constant 0 : i32
    %c0_i32_1 = arith.constant 0 : i32
    %c0_i32_2 = arith.constant 0 : i32
    return %arg0, %c0_i32, %arg1, %c0_i32_0, %c0_i32_1 : i32, i32, i32, i32, i32
  }
  func.func @transform_5(%arg0: i32, %arg1: i32) -> (i32, i32, i32, i32) {
    %c0_i32 = arith.constant 0 : i32
    %c0_i32_0 = arith.constant 0 : i32
    %c0_i32_1 = arith.constant 0 : i32
    return %arg0, %arg1, %c0_i32, %c0_i32_0 : i32, i32, i32, i32
  }
}

module attributes {stable_mosaic.version = 11 : i64} {
  func.func @_norm_relu_kernel(%arg0: i32, %arg1: i32, %arg2: memref<1x8x8x8x8xf32, #tpu.memory_space<vmem>>, %arg3: memref<1x8x1x1x1xf32, #tpu.memory_space<vmem>>, %arg4: memref<1x8x1x1x1xf32, #tpu.memory_space<vmem>>, %arg5: memref<1x8x8x8x8xf32, #tpu.memory_space<vmem>>) attributes {dimension_semantics = [#tpu.dimension_semantics<parallel>, #tpu.dimension_semantics<parallel>], iteration_bounds = array<i64: 2, 1>, scalar_prefetch = 0 : i64, scratch_operands = 0 : i64, tpu.core_type = #tpu.core_type<tc>, window_params = [{transform_indices = @transform_0, window_bounds = array<i64: 1, 8, 8, 8, 8>}, {transform_indices = @transform_1, window_bounds = array<i64: 1, 8, 1, 1, 1>}, {transform_indices = @transform_2, window_bounds = array<i64: 1, 8, 1, 1, 1>}, {transform_indices = @transform_3, window_bounds = array<i64: 1, 8, 8, 8, 8>}]} {
    %c0 = arith.constant 0 : index
    %c0_0 = arith.constant 0 : index
    %c0_1 = arith.constant 0 : index
    %c0_2 = arith.constant 0 : index
    %c0_3 = arith.constant 0 : index
    %0 = vector.load %arg2[%c0, %c0_0, %c0_1, %c0_2, %c0_3] : memref<1x8x8x8x8xf32, #tpu.memory_space<vmem>>, vector<1x8x8x8x8xf32>
    %1 = vector.shape_cast %0 : vector<1x8x8x8x8xf32> to vector<8x8x8x8xf32>
    %c0_4 = arith.constant 0 : index
    %c0_5 = arith.constant 0 : index
    %c0_6 = arith.constant 0 : index
    %c0_7 = arith.constant 0 : index
    %c0_8 = arith.constant 0 : index
    %2 = vector.load %arg3[%c0_4, %c0_5, %c0_6, %c0_7, %c0_8] : memref<1x8x1x1x1xf32, #tpu.memory_space<vmem>>, vector<1x8x1x1x1xf32>
    %3 = vector.shape_cast %2 : vector<1x8x1x1x1xf32> to vector<8x1x1x1xf32>
    %4 = vector.broadcast %3 : vector<8x1x1x1xf32> to vector<8x8x8x8xf32>
    %5 = arith.subf %1, %4 : vector<8x8x8x8xf32>
    %c0_9 = arith.constant 0 : index
    %c0_10 = arith.constant 0 : index
    %c0_11 = arith.constant 0 : index
    %c0_12 = arith.constant 0 : index
    %c0_13 = arith.constant 0 : index
    %6 = vector.load %arg4[%c0_9, %c0_10, %c0_11, %c0_12, %c0_13] : memref<1x8x1x1x1xf32, #tpu.memory_space<vmem>>, vector<1x8x1x1x1xf32>
    %7 = vector.shape_cast %6 : vector<1x8x1x1x1xf32> to vector<8x1x1x1xf32>
    %8 = vector.broadcast %7 : vector<8x1x1x1xf32> to vector<8x8x8x8xf32>
    %9 = arith.mulf %5, %8 : vector<8x8x8x8xf32>
    %cst = arith.constant 0.000000e+00 : f32
    %10 = vector.broadcast %cst : f32 to vector<8x8x8x8xf32>
    %11 = arith.maximumf %9, %10 : vector<8x8x8x8xf32>
    %c0_14 = arith.constant 0 : index
    %c0_15 = arith.constant 0 : index
    %c0_16 = arith.constant 0 : index
    %c0_17 = arith.constant 0 : index
    %c0_18 = arith.constant 0 : index
    %12 = vector.load %arg5[%c0_14, %c0_15, %c0_16, %c0_17, %c0_18] : memref<1x8x8x8x8xf32, #tpu.memory_space<vmem>>, vector<1x8x8x8x8xf32>
    %13 = vector.shape_cast %12 : vector<1x8x8x8x8xf32> to vector<8x8x8x8xf32>
    %14 = vector.shape_cast %11 : vector<8x8x8x8xf32> to vector<1x8x8x8x8xf32>
    tpu.vector_store %arg5[%c0_14, %c0_15, %c0_16, %c0_17, %c0_18], %14 {strides = array<i32>} : memref<1x8x8x8x8xf32, #tpu.memory_space<vmem>>, vector<1x8x8x8x8xf32>,
    return
  }
  func.func @transform_0(%arg0: i32, %arg1: i32) -> (i32, i32, i32, i32, i32) {
    %c0_i32 = arith.constant 0 : i32
    %c0_i32_0 = arith.constant 0 : i32
    %c0_i32_1 = arith.constant 0 : i32
    %c0_i32_2 = arith.constant 0 : i32
    return %arg0, %c0_i32, %arg1, %c0_i32_0, %c0_i32_1 : i32, i32, i32, i32, i32
  }
  func.func @transform_1(%arg0: i32, %arg1: i32) -> (i32, i32, i32, i32, i32) {
    %c0_i32 = arith.constant 0 : i32
    %c0_i32_0 = arith.constant 0 : i32
    %c0_i32_1 = arith.constant 0 : i32
    %c0_i32_2 = arith.constant 0 : i32
    %c0_i32_3 = arith.constant 0 : i32
    return %arg0, %c0_i32, %c0_i32_0, %c0_i32_1, %c0_i32_2 : i32, i32, i32, i32, i32
  }
  func.func @transform_2(%arg0: i32, %arg1: i32) -> (i32, i32, i32, i32, i32) {
    %c0_i32 = arith.constant 0 : i32
    %c0_i32_0 = arith.constant 0 : i32
    %c0_i32_1 = arith.constant 0 : i32
    %c0_i32_2 = arith.constant 0 : i32
    %c0_i32_3 = arith.constant 0 : i32
    return %arg0, %c0_i32, %c0_i32_0, %c0_i32_1, %c0_i32_2 : i32, i32, i32, i32, i32
  }
  func.func @transform_3(%arg0: i32, %arg1: i32) -> (i32, i32, i32, i32, i32) {
    %c0_i32 = arith.constant 0 : i32
    %c0_i32_0 = arith.constant 0 : i32
    %c0_i32_1 = arith.constant 0 : i32
    %c0_i32_2 = arith.constant 0 : i32
    return %arg0, %c0_i32, %arg1, %c0_i32_0, %c0_i32_1 : i32, i32, i32, i32, i32
  }
}

</mosaic_0001>

<bundles_post_ra>
// kernel: permute3d_conv_block.3
= control target key start
LH: loop header
LB: loop body
LE: loop exit
PB: predicated region body
PF: predicated region fallthrough
CT: control target
= control target key end

     0   :  { %8 = vsyncpa [#allocation3], 0  ;;  %s1821_s0 = inlined_call_operand.vmem [shape: f32[2,8,8,8,8], index: 0, kind: input, shape index: {}]   ;;  %s1822_s1 = inlined_call_operand.vmem [shape: f32[2,8,1,1,1], index: 1, kind: input, shape index: {}]   ;;  %s1823_s2 = inlined_call_operand.vmem [shape: f32[2,8,1,1,1], index: 2, kind: input, shape index: {}]   ;;  %s1824_s3 = inlined_call_operand.hbm [shape: f32[2,8,8,8,8], index: 3, kind: output, shape index: {}]  }
   0x1   :  { %10 = vsyncpa [#allocation3 + $0x1], 0  ;;  %s1031_s12 = smov 0   ;;  %s1033_s13 = smov 0  }
   0x2   :  { %s1035_s14 = smov 0   ;;  %s1037_s15 = smov 0  }
   0x3   :  { %s1039_s16 = smov 0   ;;  %s1041_s17 = smov 0  }
   0x4 LB: > { %s834_s18 = sadd.s32 4294967295, %s1005_s17   ;;  %s835_s19 = sadd.s32 4294967294, %s1005_s17   ;;  %s1005_s17 = sphi %s1041_s17, %s16_s17   ;;  %s1001_s16 = sphi %s1039_s16, %s1969_s16   ;;  %s997_s15 = sphi %s1037_s15, %s1968_s15   ;;  %s993_s14 = sphi %s1035_s14, %s1967_s14   ;;  %s989_s13 = sphi %s1033_s13, %s1966_s13   ;;  %s985_s12 = sphi %s1031_s12, %s1965_s12  }
   0x5   : > { %s28_s20 = sadd.s32 1, %s1001_s16  ;;  %s117_s21 = sadd.s32 1, %s993_s14 }
   0x6   : > { %p30_p0 = scmp.ge.s32.totalorder %s28_s20, 2  ;;  %p127_p1 = scmp.ne.s32.totalorder %s993_s14, %s989_s13 }
   0x7   : > { %p128_p2 = scmp.eq.s32.totalorder %s834_s18, 1  ;;  %p133_p3 = scmp.ne.s32.totalorder %s989_s13, %s985_s12 }
   0x8   : > { %s1971_s20 = smov (%p30_p0, %s28_s20), 0  ;;  %p134_p5 = scmp.eq.s32.totalorder %s835_s19, 1 }
   0x9   : > { %p1071_p4 = por %p128_p2, %p127_p1  ;;  %s112_s23 = ssub.s32 %s1001_s16, %s1971_s20 }
   0xa   : > { %p838_p6 = scmp.ge.s32.totalorder %s1005_s17, 1  ;;  %p115_p7 = scmp.eq.s32.totalorder %s112_s23, 0 }
   0xb   : > { %p1078_p8 = por %p134_p5, %p133_p3  ;;  %p179_p9 = scmp.lt.s32.totalorder %s1005_s17, 3 }
   0xc   : > { %s1084_s25 = scalar_select %p115_p7, %s993_s14, %s117_s21  }
   0xd   : > { %p180_p10 = pnand %p838_p6, %p179_p9 }
   0xf   : > { %183 = sbr.rel (%p180_p10) target bundleno = 238 (0xee), region = 32 }
  0x16   : > { %p216_p11 = scmp.lt.s32.totalorder %s997_s15, 1  ;;  %v1007_v0 = vmov 0   ;;  %vm650_vm0 = vcmask 64512   ;;  %s212_s11 = sand.u32 1, %s989_s13  }
  0x17   : > { %926 = vset.pattern.permute.xlu1 %v1007_v0  ;;  %925 = vset.pattern.permute.xlu0 %v1007_v0  ;;  %s839_s18 = sshll.u32 %s212_s11, 9  ;;  %s866_s21 = sshll.u32 %s997_s15, 13 }
  0x18   : > { %s1088_s26 = scalar_select %p216_p11, %s997_s15, 1 }
  0x19   : > { %s1466_s19 = scalar_lea.vmem [#allocation2], %s839_s18  ;;  %s1775_s28 = scalar_lea.sflag [#allocation3], %s212_s11 }
  0x1a   : > { %s842_s27 = sshll.u32 %s1088_s26, 3  ;;  %s865_s7 = sshll.u32 %s1088_s26, 9 }
  0x1b   : > { %s228_s30 = scalar_lea.vmem %s1822_s1, %s842_s27  ;;  %s232_s6 = scalar_lea.vmem %s1823_s2, %s842_s27 }
  0x1c   : > { %v846_v1 = vld [vmem:[%s228_s30 + $0x2] ss:$0 sm:$0xff]  ;;  %v844_v2 = vld [vmem:[%s228_s30] ss:$0 sm:$0xff]  ;;  %v847_v3 = vld [vmem:[%s228_s30 + $0x3] ss:$0 sm:$0xff]  ;;  %s1101_s10 = scalar_lea.vmem %s1821_s0, %s865_s7  ;;  %s1753_s27 = scalar_lea.hbm %s1824_s3, %s866_s21 }
  0x1d   : > { %355 = vperm.xlu1 %926, %v846_v1   ;;  %347 = vperm.xlu0 %925, %v844_v2   ;;  %v845_v4 = vld [vmem:[%s228_s30 + $0x1] ss:$0 sm:$0xff]  ;;  %v849_v5 = vld [vmem:[%s228_s30 + $0x5] ss:$0 sm:$0xff]  ;;  %v848_v6 = vld [vmem:[%s228_s30 + $0x4] ss:$0 sm:$0xff] }
  0x1e   : > { %v851_v7 = vld [vmem:[%s228_s30 + $0x7] ss:$0 sm:$0xff]  ;;  %v850_v8 = vld [vmem:[%s228_s30 + $0x6] ss:$0 sm:$0xff]  ;;  %v853_v9 = vld [vmem:[%s232_s6 + $0x1] ss:$0 sm:$0xff] }
  0x1f   : > { %v852_v10 = vld [vmem:[%s232_s6] ss:$0 sm:$0xff]  ;;  %v855_v11 = vld [vmem:[%s232_s6 + $0x3] ss:$0 sm:$0xff]  ;;  %v854_v12 = vld [vmem:[%s232_s6 + $0x2] ss:$0 sm:$0xff] }
  0x20   : > { %v857_v13 = vld [vmem:[%s232_s6 + $0x5] ss:$0 sm:$0xff]  ;;  %v856_v14 = vld [vmem:[%s232_s6 + $0x4] ss:$0 sm:$0xff]  ;;  %v859_v15 = vld [vmem:[%s232_s6 + $0x7] ss:$0 sm:$0xff] }
  0x21   : > { %359 = vperm.xlu1 %926, %v847_v3   ;;  %351 = vperm.xlu0 %925, %v845_v4   ;;  %v858_v16 = vld [vmem:[%s232_s6 + $0x6] ss:$0 sm:$0xff]  ;;  %v1107_v18 = vld [vmem:[%s1101_s10 + $0x88] sm:$0xff]  ;;  %v1110_v19 = vld [vmem:[%s1101_s10 + $0x90] sm:$0xff]  ;;  %s731_s23 = sshll.u32 %s1466_s19, 4  ;;  %s1008_s30 = smov [#allocation2]   ;;  %s1755_s23 = int_to_ptr.vmem [resolvable:$true] %s731_s23 }
  0x22   : > { %v1104_v17 = vld [vmem:[%s1101_s10 + $0x80] sm:$0xff]  ;;  %v1113_v20 = vld [vmem:[%s1101_s10 + $0x98] sm:$0xff]  ;;  %v1119_v22 = vld [vmem:[%s1101_s10 + $0xa8] sm:$0xff]  ;;  %s927_s29 = scalar_lea.vmem %s1755_s23, 8192  ;;  %s931_s4 = sshll.u32 %s1008_s30, 4  ;;  %s932_s4 = int_to_ptr.vmem [resolvable:$false] %s931_s4 }
  0x23   : > { %v1116_v21 = vld [vmem:[%s1101_s10 + $0xa0] sm:$0xff]  ;;  %v1122_v23 = vld [vmem:[%s1101_s10 + $0xb0] sm:$0xff]  ;;  %v1125_v24 = vld [vmem:[%s1101_s10 + $0xb8] sm:$0xff]  ;;  %p928_p12 = scmp.ne.s32.totalorder %s1755_s23, %s927_s29  ;;  %s933_s5 = scalar_lea.vmem %s932_s4, 16384 }
  0x24   : > { %v1128_v25 = vld [vmem:[%s1101_s10] sm:$0xff]  ;;  %v1131_v26 = vld [vmem:[%s1101_s10 + $0x8] sm:$0xff]  ;;  %v1134_v27 = vld [vmem:[%s1101_s10 + $0x10] sm:$0xff]  ;;  %p934_p1 = scmp.lt.s32.totalorder %s1755_s23, %s932_s4  ;;  %p935_p2 = scmp.lt.s32.totalorder %s933_s5, %s927_s29 }
  0x25   : > { %367 = vperm.xlu1 %926, %v849_v5   ;;  %363 = vperm.xlu0 %925, %v848_v6   ;;  %v1137_v28 = vld [vmem:[%s1101_s10 + $0x18] sm:$0xff]  ;;  %v1140_v29 = vld [vmem:[%s1101_s10 + $0x20] sm:$0xff]  ;;  %v1143_v30 = vld [vmem:[%s1101_s10 + $0x28] sm:$0xff]  ;;  %p929_p13 = pnand %p928_p12, %p1071_p4 }
  0x26   : > { %v1146_v31 = vld [vmem:[%s1101_s10 + $0x30] sm:$0xff]  ;;  %v1149_v32 = vld [vmem:[%s1101_s10 + $0x38] sm:$0xff]  ;;  %v1156_v35 = vld [vmem:[%s1101_s10 + $0xc0] sm:$0xff]  ;;  %p936_p3 = por %p935_p2, %p934_p1 }
  0x27   : > { %v1159_v36 = vld [vmem:[%s1101_s10 + $0xc8] sm:$0xff]  ;;  %v1162_v37 = vld [vmem:[%s1101_s10 + $0xd0] sm:$0xff]  ;;  %v1165_v38 = vld [vmem:[%s1101_s10 + $0xd8] sm:$0xff]  ;;  %p930_p0 = pneg %p929_p13 }
  0x28   : > { %v1176_v43 = vld [vmem:[%s1101_s10 + $0xe0] sm:$0xff]  ;;  %v1179_v44 = vld [vmem:[%s1101_s10 + $0xe8] sm:$0xff]  ;;  %v1182_v45 = vld [vmem:[%s1101_s10 + $0xf0] sm:$0xff] }
  0x29   : > { %375 = vperm.xlu1 %926, %v851_v7   ;;  %371 = vperm.xlu0 %925, %v850_v8   ;;  %v1185_v46 = vld [vmem:[%s1101_s10 + $0xf8] sm:$0xff]  ;;  %v1196_v51 = vld [vmem:[%s1101_s10 + $0x40] sm:$0xff]  ;;  %v1199_v52 = vld [vmem:[%s1101_s10 + $0x48] sm:$0xff]  ;;  %p937_p5 = pnand %p936_p3, %p930_p0 }
  0x2a   : > { %v1202_v53 = vld [vmem:[%s1101_s10 + $0x50] sm:$0xff]  ;;  %v1205_v54 = vld [vmem:[%s1101_s10 + $0x58] sm:$0xff]  ;;  %v1216_v59 = vld [vmem:[%s1101_s10 + $0x60] sm:$0xff] }
  0x2b   : > { %v1219_v60 = vld [vmem:[%s1101_s10 + $0x68] sm:$0xff]  ;;  %v1222_v61 = vld [vmem:[%s1101_s10 + $0x70] sm:$0xff]  ;;  %v1225_v62 = vld [vmem:[%s1101_s10 + $0x78] sm:$0xff] }
  0x2c   : > { %v1240_v5 = vld [vmem:[%s1101_s10 + $0x140] sm:$0xff]  ;;  %v1243_v6 = vld [vmem:[%s1101_s10 + $0x148] sm:$0xff]  ;;  %v1246_v7 = vld [vmem:[%s1101_s10 + $0x150] sm:$0xff] }
  0x2d   : > { %495 = vperm.xlu1 %926, %v853_v9   ;;  %491 = vperm.xlu0 %925, %v852_v10   ;;  %v1249_v8 = vld [vmem:[%s1101_s10 + $0x158] sm:$0xff]  ;;  %v1280_v42 = vld [vmem:[%s1101_s10 + $0x100] sm:$0xff]  ;;  %v1283_v41 = vld [vmem:[%s1101_s10 + $0x108] sm:$0xff] }
  0x2e   : > { %1853 = vst [vmem:[#allocation5_spill] sm:$0xff] %v1249_v8  ;;  %1857 = vst [vmem:[#allocation9_spill] sm:$0xff] %v1280_v42  ;;  %v1286_v40 = vld [vmem:[%s1101_s10 + $0x110] sm:$0xff]  ;;  %v1297_v50 = vld [vmem:[%s1101_s10 + $0x118] sm:$0xff] }
  0x2f   : > { %1858 = vst [vmem:[#allocation10_spill] sm:$0xff] %v1283_v41  ;;  %1859 = vst [vmem:[#allocation11_spill] sm:$0xff] %v1286_v40  ;;  %v1318_v58 = vld [vmem:[%s1101_s10 + $0x130] sm:$0xff]  ;;  %v1321_v57 = vld [vmem:[%s1101_s10 + $0x138] sm:$0xff] }
  0x30   : > { %1860 = vst [vmem:[#allocation12_spill] sm:$0xff] %v1297_v50  ;;  %1864 = vst [vmem:[#allocation16_spill] sm:$0xff] %v1318_v58  ;;  %v1324_v56 = vld [vmem:[%s1101_s10 + $0x1c0] sm:$0xff]  ;;  %v1335_v10 = vld [vmem:[%s1101_s10 + $0x1c8] sm:$0xff] }
  0x31   : > { %503 = vperm.xlu1 %926, %v855_v11   ;;  %499 = vperm.xlu0 %925, %v854_v12   ;;  %v1300_v12 = vld [vmem:[%s1101_s10 + $0x120] sm:$0xff]  ;;  %v1303_v11 = vld [vmem:[%s1101_s10 + $0x128] sm:$0xff]  ;;  %1865 = vst [vmem:[#allocation17_spill] sm:$0xff] %v1321_v57  ;;  %v1338_v47 = vld [vmem:[%s1101_s10 + $0x1d0] sm:$0xff] }
  0x32   : > { %1861 = vst [vmem:[#allocation13_spill] sm:$0xff] %v1300_v12  ;;  %1862 = vst [vmem:[#allocation14_spill] sm:$0xff] %v1303_v11  ;;  %v1341_v48 = vld [vmem:[%s1101_s10 + $0x1d8] sm:$0xff]  ;;  %v1352_v49 = vld [vmem:[%s1101_s10 + $0x1e0] sm:$0xff] }
  0x33   : > { %1866 = vst [vmem:[#allocation18_spill] sm:$0xff] %v1341_v48  ;;  %v1355_v39 = vld [vmem:[%s1101_s10 + $0x1e8] sm:$0xff]  ;;  %v1358_v8 = vld [vmem:[%s1101_s10 + $0x1f0] sm:$0xff]  ;;  %v1394_v42 = vld [vmem:[%s1101_s10 + $0x198] sm:$0xff] }
  0x34   : > { %1867 = vst [vmem:[#allocation19_spill] sm:$0xff] %v1355_v39  ;;  %v1391_v41 = vld [vmem:[%s1101_s10 + $0x190] sm:$0xff]  ;;  %1872 = vst [vmem:[#allocation24_spill] sm:$0xff] %v1394_v42  ;;  %v1397_v55 = vld [vmem:[%s1101_s10 + $0x1a0] sm:$0xff] }
  0x35   : > { %511 = vperm.xlu1 %926, %v857_v13   ;;  %507 = vperm.xlu0 %925, %v856_v14   ;;  %v1260_v13 = vld [vmem:[%s1101_s10 + $0x160] sm:$0xff]  ;;  %v1263_v14 = vld [vmem:[%s1101_s10 + $0x168] sm:$0xff]  ;;  %1871 = vst [vmem:[#allocation23_spill] sm:$0xff] %v1391_v41  ;;  %1873 = vst [vmem:[#allocation25_spill] sm:$0xff] %v1397_v55 }
  0x36   : > { %1854 = vst [vmem:[#allocation6_spill] sm:$0xff] %v1263_v14  ;;  %v1375_v14 = vld [vmem:[%s1101_s10 + $0x188] sm:$0xff]  ;;  %v1411_v11 = vld [vmem:[%s1101_s10 + $0x1b0] sm:$0xff]  ;;  %v1414_v12 = vld [vmem:[%s1101_s10 + $0x1b8] sm:$0xff] }
  0x37   : > { %1869 = vst [vmem:[#allocation21_spill] sm:$0xff] %v1375_v14  ;;  %v1408_v58 = vld [vmem:[%s1101_s10 + $0x1a8] sm:$0xff]  ;;  %1875 = vst [vmem:[#allocation27_spill] sm:$0xff] %v1411_v11 }
  0x38   : > { %1874 = vst [vmem:[#allocation26_spill] sm:$0xff] %v1408_v58  ;;  %1876 = vst [vmem:[#allocation28_spill] sm:$0xff] %v1414_v12 }
  0x39   : > { %519 = vperm.xlu1 %926, %v859_v15   ;;  %515 = vperm.xlu0 %925, %v858_v16   ;;  %v1266_v15 = vld [vmem:[%s1101_s10 + $0x170] sm:$0xff]  ;;  %v1269_v16 = vld [vmem:[%s1101_s10 + $0x178] sm:$0xff] }
  0x3a   : > { %1855 = vst [vmem:[#allocation7_spill] sm:$0xff] %v1266_v15  ;;  %1856 = vst [vmem:[#allocation8_spill] sm:$0xff] %v1269_v16  ;;  %v1369_v16 = vld [vmem:[%s1101_s10 + $0x1f8] sm:$0xff]  ;;  %v1372_v15 = vld [vmem:[%s1101_s10 + $0x180] sm:$0xff] }
  0x3b   : > { %1868 = vst [vmem:[#allocation20_spill] sm:$0xff] %v1369_v16 }
  0x9c   : > { %v1151_v33 = vpop.permute.xlu1 %355  ;;  %v1153_v34 = vpop.permute.xlu0 %347 }
  0xa0   : > { %v1235_v3 = vpop.permute.xlu1 %359  ;;  %v1237_v4 = vpop.permute.xlu0 %351 }
  0xa1   : > { %v1877_v48 = vsub.f32 %v1196_v51, %v1237_v4  ;;  %v1878_v1 = vsub.f32 %v1199_v52, %v1237_v4  ;;  %v1879_v9 = vsub.f32 %v1202_v53, %v1237_v4  ;;  %v1880_v2 = vsub.f32 %v1205_v54, %v1237_v4 }
  0xa2   : > { %v1881_v16 = vsub.f32 %v1216_v59, %v1237_v4  ;;  %v1882_v51 = vsub.f32 %v1219_v60, %v1237_v4  ;;  %v1883_v52 = vsub.f32 %v1222_v61, %v1237_v4  ;;  %v1884_v53 = vsub.f32 %v1225_v62, %v1237_v4 }
  0xa3   : > { %v1888_v61 = vsub.f32 %v1137_v28, %v1153_v34  ;;  %v1892_v4 = vsub.f32 %v1149_v32, %v1153_v34 }
  0xa4   : > { %v1313_v0 = vpop.permute.xlu1 %367  ;;  %v1315_v63 = vpop.permute.xlu0 %363 }
  0xa5   : > { %1863 = vst [vmem:[#allocation15_spill] sm:$0xff] %v1315_v63 }
  0xa8   : > { %v1385_v50 = vpop.permute.xlu1 %375  ;;  %v1387_v40 = vpop.permute.xlu0 %371 }
  0xa9   : > { %1870 = vst [vmem:[#allocation22_spill] sm:$0xff] %v1387_v40 }
  0xac   : > { %v496_v39 = vpop.permute.xlu1 %495  ;;  %v492_v12 = vpop.permute.xlu0 %491 }
  0xad   : > { %v530_v63 = vmul.f32 %v496_v39, %v1877_v48  ;;  %v531_v42 = vmul.f32 %v496_v39, %v1878_v1  ;;  %v532_v55 = vmul.f32 %v496_v39, %v1879_v9  ;;  %v533_v58 = vmul.f32 %v496_v39, %v1880_v2 }
  0xae   : > { %v534_v57 = vmul.f32 %v496_v39, %v1881_v16  ;;  %v535_v48 = vmul.f32 %v496_v39, %v1882_v51  ;;  %v536_v1 = vmul.f32 %v496_v39, %v1883_v52  ;;  %v537_v9 = vmul.f32 %v496_v39, %v1884_v53 }
  0xaf   : > { %v594_v11 = vmax.f32 %v530_v63, 0.0  ;;  %v595_v54 = vmax.f32 %v531_v42, 0.0  ;;  %v596_v2 = vmax.f32 %v532_v55, 0.0  ;;  %v597_v41 = vmax.f32 %v533_v58, 0.0 }
  0xb0   : > { %v598_v14 = vmax.f32 %v534_v57, 0.0  ;;  %v599_v59 = vmax.f32 %v535_v48, 0.0  ;;  %v600_v16 = vmax.f32 %v536_v1, 0.0  ;;  %v601_v40 = vmax.f32 %v537_v9, 0.0 }
  0xb1   : > { %659 = vst.msk [vmem:[%s1466_s19 + $0x40] sm:$0xff] %vm650_vm0, %v594_v11  ;;  %660 = vst.msk [vmem:[%s1466_s19 + $0x48] sm:$0xff] %vm650_vm0, %v595_v54  ;;  %v1885_v39 = vsub.f32 %v1128_v25, %v1153_v34  ;;  %v1886_v55 = vsub.f32 %v1131_v26, %v1153_v34  ;;  %v1887_v58 = vsub.f32 %v1134_v27, %v1153_v34 }
  0xb2   : > { %661 = vst.msk [vmem:[%s1466_s19 + $0x50] sm:$0xff] %vm650_vm0, %v596_v2  ;;  %662 = vst.msk [vmem:[%s1466_s19 + $0x58] sm:$0xff] %vm650_vm0, %v597_v41  ;;  %v525_v62 = vmul.f32 %v492_v12, %v1888_v61  ;;  %v1889_v25 = vsub.f32 %v1140_v29, %v1153_v34  ;;  %v1890_v27 = vsub.f32 %v1143_v30, %v1153_v34 }
  0xb3   : > { %v522_v42 = vmul.f32 %v492_v12, %v1885_v39  ;;  %v523_v57 = vmul.f32 %v492_v12, %v1886_v55  ;;  %v524_v60 = vmul.f32 %v492_v12, %v1887_v58  ;;  %663 = vst.msk [vmem:[%s1466_s19 + $0x60] sm:$0xff] %vm650_vm0, %v598_v14  ;;  %664 = vst.msk [vmem:[%s1466_s19 + $0x68] sm:$0xff] %vm650_vm0, %v599_v59  ;;  %v504_v14 = vpop.permute.xlu1 %503 }
  0xb4   : > { %665 = vst.msk [vmem:[%s1466_s19 + $0x70] sm:$0xff] %vm650_vm0, %v600_v16  ;;  %666 = vst.msk [vmem:[%s1466_s19 + $0x78] sm:$0xff] %vm650_vm0, %v601_v40  ;;  %v526_v26 = vmul.f32 %v492_v12, %v1889_v25  ;;  %v527_v28 = vmul.f32 %v492_v12, %v1890_v27  ;;  %v1891_v41 = vsub.f32 %v1146_v31, %v1153_v34  ;;  %v589_v48 = vmax.f32 %v525_v62, 0.0 }
  0xb5   : > { %v529_v11 = vmul.f32 %v492_v12, %v1892_v4  ;;  %v586_v40 = vmax.f32 %v522_v42, 0.0  ;;  %v587_v51 = vmax.f32 %v523_v57, 0.0  ;;  %v588_v29 = vmax.f32 %v524_v60, 0.0  ;;  %v500_v57 = vpop.permute.xlu0 %499 }
  0xb6   : > { %v528_v63 = vmul.f32 %v492_v12, %v1891_v41  ;;  %v590_v30 = vmax.f32 %v526_v26, 0.0  ;;  %v591_v52 = vmax.f32 %v527_v28, 0.0  ;;  %654 = vst.msk [vmem:[%s1466_s19 + $0x18] sm:$0xff] %vm650_vm0, %v589_v48  ;;  %v1893_v31 = vsub.f32 %v1156_v35, %v1235_v3 }
  0xb7   : > { %v593_v53 = vmax.f32 %v529_v11, 0.0  ;;  %651 = vst.msk [vmem:[%s1466_s19] sm:$0xff] %vm650_vm0, %v586_v40  ;;  %652 = vst.msk [vmem:[%s1466_s19 + $0x8] sm:$0xff] %vm650_vm0, %v587_v51  ;;  %v1894_v34 = vsub.f32 %v1159_v36, %v1235_v3  ;;  %v1895_v9 = vsub.f32 %v1162_v37, %v1235_v3  ;;  %v1896_v2 = vsub.f32 %v1165_v38, %v1235_v3 }
  0xb8   : > { %v592_v1 = vmax.f32 %v528_v63, 0.0  ;;  %653 = vst.msk [vmem:[%s1466_s19 + $0x10] sm:$0xff] %vm650_vm0, %v588_v29  ;;  %v546_v32 = vmul.f32 %v504_v14, %v1893_v31  ;;  %655 = vst.msk [vmem:[%s1466_s19 + $0x20] sm:$0xff] %vm650_vm0, %v590_v30  ;;  %v1897_v35 = vsub.f32 %v1176_v43, %v1235_v3  ;;  %v1898_v37 = vsub.f32 %v1179_v44, %v1235_v3  ;;  %v512_v29 = vpop.permute.xlu1 %511 }
  0xb9   : > { %v547_v12 = vmul.f32 %v504_v14, %v1894_v34  ;;  %v548_v54 = vmul.f32 %v504_v14, %v1895_v9  ;;  %v549_v59 = vmul.f32 %v504_v14, %v1896_v2  ;;  %656 = vst.msk [vmem:[%s1466_s19 + $0x28] sm:$0xff] %vm650_vm0, %v591_v52  ;;  %658 = vst.msk [vmem:[%s1466_s19 + $0x38] sm:$0xff] %vm650_vm0, %v593_v53  ;;  %v1912_v9 = vld [vmem:[#allocation5_spill] sm:$0xff] }
  0xba   : > { %657 = vst.msk [vmem:[%s1466_s19 + $0x30] sm:$0xff] %vm650_vm0, %v592_v1  ;;  %v550_v36 = vmul.f32 %v504_v14, %v1897_v35  ;;  %v551_v38 = vmul.f32 %v504_v14, %v1898_v37  ;;  %v1899_v16 = vsub.f32 %v1182_v45, %v1235_v3  ;;  %v1900_v42 = vsub.f32 %v1185_v46, %v1235_v3 }
  0xbb   : > { %v610_v58 = vmax.f32 %v546_v32, 0.0  ;;  %v611_v60 = vmax.f32 %v547_v12, 0.0  ;;  %v612_v43 = vmax.f32 %v548_v54, 0.0  ;;  %v613_v61 = vmax.f32 %v549_v59, 0.0 }
  0xbc   : > { %v552_v39 = vmul.f32 %v504_v14, %v1899_v16  ;;  %v553_v55 = vmul.f32 %v504_v14, %v1900_v42  ;;  %v614_v44 = vmax.f32 %v550_v36, 0.0  ;;  %v615_v62 = vmax.f32 %v551_v38, 0.0  ;;  %v1917_v36 = vld [vmem:[#allocation7_spill] sm:$0xff]  ;;  %v1919_v16 = vld [vmem:[#allocation8_spill] sm:$0xff] }
  0xbd   : > { %675 = vst.msk [vmem:[%s1466_s19 + $0xc0] sm:$0xff] %vm650_vm0, %v610_v58  ;;  %676 = vst.msk [vmem:[%s1466_s19 + $0xc8] sm:$0xff] %vm650_vm0, %v611_v60  ;;  %v1901_v45 = vsub.f32 %v1104_v17, %v1151_v33  ;;  %v1902_v3 = vsub.f32 %v1107_v18, %v1151_v33  ;;  %v1903_v28 = vsub.f32 %v1110_v19, %v1151_v33 }
  0xbe   : > { %v616_v25 = vmax.f32 %v552_v39, 0.0  ;;  %v617_v26 = vmax.f32 %v553_v55, 0.0  ;;  %677 = vst.msk [vmem:[%s1466_s19 + $0xd0] sm:$0xff] %vm650_vm0, %v612_v43  ;;  %678 = vst.msk [vmem:[%s1466_s19 + $0xd8] sm:$0xff] %vm650_vm0, %v613_v61  ;;  %v1904_v63 = vsub.f32 %v1113_v20, %v1151_v33  ;;  %v1905_v17 = vsub.f32 %v1116_v21, %v1151_v33  ;;  %v508_v55 = vpop.permute.xlu0 %507 }
  0xbf   : > { %v538_v46 = vmul.f32 %v500_v57, %v1901_v45  ;;  %v539_v27 = vmul.f32 %v500_v57, %v1902_v3  ;;  %v540_v41 = vmul.f32 %v500_v57, %v1903_v28  ;;  %679 = vst.msk [vmem:[%s1466_s19 + $0xe0] sm:$0xff] %vm650_vm0, %v614_v44  ;;  %680 = vst.msk [vmem:[%s1466_s19 + $0xe8] sm:$0xff] %vm650_vm0, %v615_v62  ;;  %v1926_v28 = vld [vmem:[#allocation11_spill] sm:$0xff] }
  0xc0   : > { %v541_v4 = vmul.f32 %v500_v57, %v1904_v63  ;;  %681 = vst.msk [vmem:[%s1466_s19 + $0xf0] sm:$0xff] %vm650_vm0, %v616_v25  ;;  %682 = vst.msk [vmem:[%s1466_s19 + $0xf8] sm:$0xff] %vm650_vm0, %v617_v26  ;;  %v542_v18 = vmul.f32 %v500_v57, %v1905_v17  ;;  %v1906_v19 = vsub.f32 %v1119_v22, %v1151_v33  ;;  %v1922_v25 = vld [vmem:[#allocation15_spill] sm:$0xff] }
  0xc1   : > { %v1907_v11 = vsub.f32 %v1122_v23, %v1151_v33  ;;  %v1908_v40 = vsub.f32 %v1125_v24, %v1151_v33  ;;  %v602_v48 = vmax.f32 %v538_v46, 0.0  ;;  %v603_v30 = vmax.f32 %v539_v27, 0.0  ;;  %v1924_v46 = vld [vmem:[#allocation10_spill] sm:$0xff] }
  0xc2   : > { %v543_v20 = vmul.f32 %v500_v57, %v1906_v19  ;;  %v604_v21 = vmax.f32 %v540_v41, 0.0  ;;  %v605_v52 = vmax.f32 %v541_v4, 0.0  ;;  %v606_v22 = vmax.f32 %v542_v18, 0.0  ;;  %v1928_v4 = vld [vmem:[#allocation12_spill] sm:$0xff]  ;;  %v1930_v19 = vld [vmem:[#allocation13_spill] sm:$0xff] }
  0xc3   : > { %v544_v14 = vmul.f32 %v500_v57, %v1907_v11  ;;  %v545_v51 = vmul.f32 %v500_v57, %v1908_v40  ;;  %667 = vst.msk [vmem:[%s1466_s19 + $0x80] sm:$0xff] %vm650_vm0, %v602_v48  ;;  %668 = vst.msk [vmem:[%s1466_s19 + $0x88] sm:$0xff] %vm650_vm0, %v603_v30  ;;  %v1909_v23 = vsub.f32 %v1240_v5, %v1313_v0 }
  0xc4   : > { %v607_v1 = vmax.f32 %v543_v20, 0.0  ;;  %669 = vst.msk [vmem:[%s1466_s19 + $0x90] sm:$0xff] %vm650_vm0, %v604_v21  ;;  %670 = vst.msk [vmem:[%s1466_s19 + $0x98] sm:$0xff] %vm650_vm0, %v605_v52  ;;  %v1910_v33 = vsub.f32 %v1243_v6, %v1313_v0  ;;  %v1911_v34 = vsub.f32 %v1246_v7, %v1313_v0  ;;  %v1913_v54 = vsub.f32 %v1912_v9, %v1313_v0  ;;  %v1915_v7 = vld [vmem:[#allocation6_spill] sm:$0xff]  ;;  %v1936_v21 = vld [vmem:[#allocation17_spill] sm:$0xff] }
  0xc5   : > { %v608_v53 = vmax.f32 %v544_v14, 0.0  ;;  %v609_v31 = vmax.f32 %v545_v51, 0.0  ;;  %v562_v24 = vmul.f32 %v512_v29, %v1909_v23  ;;  %671 = vst.msk [vmem:[%s1466_s19 + $0xa0] sm:$0xff] %vm650_vm0, %v606_v22  ;;  %v1914_v5 = vsub.f32 %v1260_v13, %v1313_v0  ;;  %v1932_v14 = vld [vmem:[#allocation14_spill] sm:$0xff] }
  0xc6   : > { %v563_v32 = vmul.f32 %v512_v29, %v1910_v33  ;;  %v564_v12 = vmul.f32 %v512_v29, %v1911_v34  ;;  %v565_v2 = vmul.f32 %v512_v29, %v1913_v54  ;;  %672 = vst.msk [vmem:[%s1466_s19 + $0xa8] sm:$0xff] %vm650_vm0, %v607_v1  ;;  %v1916_v59 = vsub.f32 %v1915_v7, %v1313_v0  ;;  %v520_v1 = vpop.permute.xlu1 %519 }
  0xc7   : > { %673 = vst.msk [vmem:[%s1466_s19 + $0xb0] sm:$0xff] %vm650_vm0, %v608_v53  ;;  %674 = vst.msk [vmem:[%s1466_s19 + $0xb8] sm:$0xff] %vm650_vm0, %v609_v31  ;;  %v566_v6 = vmul.f32 %v512_v29, %v1914_v5  ;;  %v1918_v37 = vsub.f32 %v1917_v36, %v1313_v0  ;;  %v1920_v39 = vsub.f32 %v1919_v16, %v1313_v0  ;;  %v626_v57 = vmax.f32 %v562_v24, 0.0  ;;  %v1921_v0 = vld [vmem:[#allocation9_spill] sm:$0xff] }
  0xc8   : > { %v567_v35 = vmul.f32 %v512_v29, %v1916_v59  ;;  %v627_v58 = vmax.f32 %v563_v32, 0.0  ;;  %v628_v13 = vmax.f32 %v564_v12, 0.0  ;;  %v629_v60 = vmax.f32 %v565_v2, 0.0  ;;  %v1941_v59 = vld [vmem:[#allocation18_spill] sm:$0xff] }
  0xc9   : > { %v568_v38 = vmul.f32 %v512_v29, %v1918_v37  ;;  %v569_v42 = vmul.f32 %v512_v29, %v1920_v39  ;;  %v630_v43 = vmax.f32 %v566_v6, 0.0  ;;  %691 = vst.msk [vmem:[%s1466_s19 + $0x140] sm:$0xff] %vm650_vm0, %v626_v57  ;;  %v1923_v26 = vsub.f32 %v1921_v0, %v1922_v25  ;;  %v1934_v29 = vld [vmem:[#allocation16_spill] sm:$0xff] }
  0xca   : > { %v631_v61 = vmax.f32 %v567_v35, 0.0  ;;  %692 = vst.msk [vmem:[%s1466_s19 + $0x148] sm:$0xff] %vm650_vm0, %v627_v58  ;;  %693 = vst.msk [vmem:[%s1466_s19 + $0x150] sm:$0xff] %vm650_vm0, %v628_v13  ;;  %v1925_v3 = vsub.f32 %v1924_v46, %v1922_v25  ;;  %v1927_v41 = vsub.f32 %v1926_v28, %v1922_v25  ;;  %v1929_v17 = vsub.f32 %v1928_v4, %v1922_v25  ;;  %v516_v58 = vpop.permute.xlu0 %515 }
  0xcb   : > { %v632_v44 = vmax.f32 %v568_v38, 0.0  ;;  %v633_v62 = vmax.f32 %v569_v42, 0.0  ;;  %694 = vst.msk [vmem:[%s1466_s19 + $0x158] sm:$0xff] %vm650_vm0, %v629_v60  ;;  %v554_v45 = vmul.f32 %v508_v55, %v1923_v26  ;;  %695 = vst.msk [vmem:[%s1466_s19 + $0x160] sm:$0xff] %vm650_vm0, %v630_v43  ;;  %v1931_v20 = vsub.f32 %v1930_v19, %v1922_v25  ;;  %v1947_v42 = vld [vmem:[#allocation20_spill] sm:$0xff]  ;;  %v1951_v26 = vld [vmem:[#allocation21_spill] sm:$0xff] }
  0xcc   : > { %v555_v27 = vmul.f32 %v508_v55, %v1925_v3  ;;  %v556_v63 = vmul.f32 %v508_v55, %v1927_v41  ;;  %v557_v18 = vmul.f32 %v508_v55, %v1929_v17  ;;  %696 = vst.msk [vmem:[%s1466_s19 + $0x168] sm:$0xff] %vm650_vm0, %v631_v61  ;;  %v1933_v40 = vsub.f32 %v1932_v14, %v1922_v25  ;;  %v1953_v3 = vld [vmem:[#allocation23_spill] sm:$0xff]  ;;  %v1955_v41 = vld [vmem:[#allocation24_spill] sm:$0xff]  ;;  %v1959_v19 = vld [vmem:[#allocation26_spill] sm:$0xff] }
  0xcd   : > { %697 = vst.msk [vmem:[%s1466_s19 + $0x170] sm:$0xff] %vm650_vm0, %v632_v44  ;;  %698 = vst.msk [vmem:[%s1466_s19 + $0x178] sm:$0xff] %vm650_vm0, %v633_v62  ;;  %v558_v11 = vmul.f32 %v508_v55, %v1931_v20  ;;  %v1935_v48 = vsub.f32 %v1934_v29, %v1922_v25  ;;  %v1937_v52 = vsub.f32 %v1936_v21, %v1922_v25  ;;  %v618_v53 = vmax.f32 %v554_v45, 0.0  ;;  %v1961_v14 = vld [vmem:[#allocation27_spill] sm:$0xff]  ;;  %v1963_v29 = vld [vmem:[#allocation28_spill] sm:$0xff] }
  0xce   : > { %v559_v51 = vmul.f32 %v508_v55, %v1933_v40  ;;  %v619_v31 = vmax.f32 %v555_v27, 0.0  ;;  %v620_v23 = vmax.f32 %v556_v63, 0.0  ;;  %v621_v24 = vmax.f32 %v557_v18, 0.0 }
  0xcf   : > { %v560_v30 = vmul.f32 %v508_v55, %v1935_v48  ;;  %v561_v22 = vmul.f32 %v508_v55, %v1937_v52  ;;  %v622_v33 = vmax.f32 %v558_v11, 0.0  ;;  %683 = vst.msk [vmem:[%s1466_s19 + $0x100] sm:$0xff] %vm650_vm0, %v618_v53  ;;  %v1938_v9 = vsub.f32 %v1324_v56, %v1385_v50 }
  0xd0   : > { %v623_v32 = vmax.f32 %v559_v51, 0.0  ;;  %684 = vst.msk [vmem:[%s1466_s19 + $0x108] sm:$0xff] %vm650_vm0, %v619_v31  ;;  %685 = vst.msk [vmem:[%s1466_s19 + $0x110] sm:$0xff] %vm650_vm0, %v620_v23  ;;  %v1939_v2 = vsub.f32 %v1335_v10, %v1385_v50  ;;  %v1940_v6 = vsub.f32 %v1338_v47, %v1385_v50  ;;  %v1942_v35 = vsub.f32 %v1941_v59, %v1385_v50  ;;  %v1944_v10 = vld [vmem:[#allocation19_spill] sm:$0xff] }
  0xd1   : > { %v624_v34 = vmax.f32 %v560_v30, 0.0  ;;  %v625_v12 = vmax.f32 %v561_v22, 0.0  ;;  %686 = vst.msk [vmem:[%s1466_s19 + $0x118] sm:$0xff] %vm650_vm0, %v621_v24  ;;  %v578_v54 = vmul.f32 %v520_v1, %v1938_v9  ;;  %687 = vst.msk [vmem:[%s1466_s19 + $0x120] sm:$0xff] %vm650_vm0, %v622_v33  ;;  %v1943_v56 = vsub.f32 %v1352_v49, %v1385_v50 }
  0xd2   : > { %v579_v5 = vmul.f32 %v520_v1, %v1939_v2  ;;  %v580_v7 = vmul.f32 %v520_v1, %v1940_v6  ;;  %v581_v36 = vmul.f32 %v520_v1, %v1942_v35  ;;  %688 = vst.msk [vmem:[%s1466_s19 + $0x128] sm:$0xff] %vm650_vm0, %v623_v32  ;;  %v1945_v37 = vsub.f32 %v1944_v10, %v1385_v50 }
  0xd3   : > { %689 = vst.msk [vmem:[%s1466_s19 + $0x130] sm:$0xff] %vm650_vm0, %v624_v34  ;;  %690 = vst.msk [vmem:[%s1466_s19 + $0x138] sm:$0xff] %vm650_vm0, %v625_v12  ;;  %v582_v47 = vmul.f32 %v520_v1, %v1943_v56  ;;  %v1946_v16 = vsub.f32 %v1358_v8, %v1385_v50  ;;  %v1948_v55 = vsub.f32 %v1947_v42, %v1385_v50  ;;  %v642_v13 = vmax.f32 %v578_v54, 0.0  ;;  %v1949_v50 = vld [vmem:[#allocation22_spill] sm:$0xff] }
  0xd4   : > { %v583_v38 = vmul.f32 %v520_v1, %v1945_v37  ;;  %v643_v49 = vmax.f32 %v579_v5, 0.0  ;;  %v644_v60 = vmax.f32 %v580_v7, 0.0  ;;  %v645_v43 = vmax.f32 %v581_v36, 0.0 }
  0xd5   : > { %v584_v39 = vmul.f32 %v520_v1, %v1946_v16  ;;  %v585_v57 = vmul.f32 %v520_v1, %v1948_v55  ;;  %v646_v61 = vmax.f32 %v582_v47, 0.0  ;;  %707 = vst.msk [vmem:[%s1466_s19 + $0x1c0] sm:$0xff] %vm650_vm0, %v642_v13  ;;  %v1950_v0 = vsub.f32 %v1372_v15, %v1949_v50  ;;  %v1957_v15 = vld [vmem:[#allocation25_spill] sm:$0xff] }
  0xd6   : > { %v647_v44 = vmax.f32 %v583_v38, 0.0  ;;  %708 = vst.msk [vmem:[%s1466_s19 + $0x1c8] sm:$0xff] %vm650_vm0, %v643_v49  ;;  %709 = vst.msk [vmem:[%s1466_s19 + $0x1d0] sm:$0xff] %vm650_vm0, %v644_v60  ;;  %v1952_v45 = vsub.f32 %v1951_v26, %v1949_v50  ;;  %v1954_v27 = vsub.f32 %v1953_v3, %v1949_v50  ;;  %v1956_v63 = vsub.f32 %v1955_v41, %v1949_v50 }
  0xd7   : > { %v648_v62 = vmax.f32 %v584_v39, 0.0  ;;  %v649_v8 = vmax.f32 %v585_v57, 0.0  ;;  %710 = vst.msk [vmem:[%s1466_s19 + $0x1d8] sm:$0xff] %vm650_vm0, %v645_v43  ;;  %v570_v25 = vmul.f32 %v516_v58, %v1950_v0  ;;  %711 = vst.msk [vmem:[%s1466_s19 + $0x1e0] sm:$0xff] %vm650_vm0, %v646_v61  ;;  %v1958_v17 = vsub.f32 %v1957_v15, %v1949_v50 }
  0xd8   : > { %v571_v46 = vmul.f32 %v516_v58, %v1952_v45  ;;  %v572_v28 = vmul.f32 %v516_v58, %v1954_v27  ;;  %v573_v4 = vmul.f32 %v516_v58, %v1956_v63  ;;  %712 = vst.msk [vmem:[%s1466_s19 + $0x1e8] sm:$0xff] %vm650_vm0, %v647_v44  ;;  %v1960_v20 = vsub.f32 %v1959_v19, %v1949_v50 }
  0xd9   : > { %713 = vst.msk [vmem:[%s1466_s19 + $0x1f0] sm:$0xff] %vm650_vm0, %v648_v62  ;;  %714 = vst.msk [vmem:[%s1466_s19 + $0x1f8] sm:$0xff] %vm650_vm0, %v649_v8  ;;  %v574_v18 = vmul.f32 %v516_v58, %v1958_v17  ;;  %v1962_v40 = vsub.f32 %v1961_v14, %v1949_v50  ;;  %v1964_v48 = vsub.f32 %v1963_v29, %v1949_v50  ;;  %v634_v21 = vmax.f32 %v570_v25, 0.0 }
  0xda   : > { %v575_v11 = vmul.f32 %v516_v58, %v1960_v20  ;;  %v635_v52 = vmax.f32 %v571_v46, 0.0  ;;  %v636_v22 = vmax.f32 %v572_v28, 0.0  ;;  %v637_v1 = vmax.f32 %v573_v4, 0.0 }
  0xdb   : > { %v576_v51 = vmul.f32 %v516_v58, %v1962_v40  ;;  %v577_v30 = vmul.f32 %v516_v58, %v1964_v48  ;;  %v638_v53 = vmax.f32 %v574_v18, 0.0  ;;  %699 = vst.msk [vmem:[%s1466_s19 + $0x180] sm:$0xff] %vm650_vm0, %v634_v21 }
  0xdc   : > { %v639_v31 = vmax.f32 %v575_v11, 0.0  ;;  %700 = vst.msk [vmem:[%s1466_s19 + $0x188] sm:$0xff] %vm650_vm0, %v635_v52  ;;  %701 = vst.msk [vmem:[%s1466_s19 + $0x190] sm:$0xff] %vm650_vm0, %v636_v22 }
  0xdd   : > { %v640_v23 = vmax.f32 %v576_v51, 0.0  ;;  %v641_v24 = vmax.f32 %v577_v30, 0.0  ;;  %702 = vst.msk [vmem:[%s1466_s19 + $0x198] sm:$0xff] %vm650_vm0, %v637_v1  ;;  %703 = vst.msk [vmem:[%s1466_s19 + $0x1a0] sm:$0xff] %vm650_vm0, %v638_v53 }
  0xde   : > { %704 = vst.msk [vmem:[%s1466_s19 + $0x1a8] sm:$0xff] %vm650_vm0, %v639_v31 }
  0xdf   : > { %705 = vst.msk [vmem:[%s1466_s19 + $0x1b0] sm:$0xff] %vm650_vm0, %v640_v23  ;;  %706 = vst.msk [vmem:[%s1466_s19 + $0x1b8] sm:$0xff] %vm650_vm0, %v641_v24 }
  0xe0   : > { %940 = shalt.err (!%p937_p5)
}
  0xe1   : > { %s941_s6 = scalar_lea.hbm %s1753_s27, 8192  ;;  %s945_s9 = scalar_lea.hbm %s1824_s3, 16384 }
  0xe2   : > { %p942_p6 = scmp.ne.s32.totalorder %s1753_s27, %s941_s6  ;;  %p946_p10 = scmp.lt.u32.totalorder %s1753_s27, %s1824_s3 }
  0xe3   : > { %p947_p11 = scmp.lt.u32.totalorder %s945_s9, %s941_s6  ;;  %p949_p13 = scmp.lt.u32.totalorder %s941_s6, %s1753_s27 }
  0xe4   : > { %p943_p7 = pnand %p942_p6, %p1071_p4 }
  0xe5   : > { %p948_p12 = por %p947_p11, %p946_p10 }
  0xe6   : > { %p944_p9 = pneg %p943_p7 }
  0xe7   : > { %p950_p0 = por %p949_p13, %p948_p12 }
  0xe9   : > { %p951_p1 = pnand %p950_p0, %p944_p9 }
  0xeb   : > { %954 = shalt.err (!%p951_p1)
}
  0xec   : > { %s1009_s18 = smov 128   ;;  %s1010_s19 = smov 8  }
  0xed   : > { %867 = dma.vmem_to_hbm [thread:$0]  (%p1071_p4), %s1755_s23, 8192, %s1753_s27, %s1775_s28, %s1009_s18, %s1009_s18, %s1010_s19  }
  0xee PF: > { %p873_p2 = scmp.ge.s32.totalorder %s1005_s17, 2  ;;  %s746_s21 = sand.u32 1, %s985_s12  }
  0xef   : > { %s747_s15 = scalar_lea.sflag [#allocation3], %s746_s21 }
  0xf0   : > { %p870_p3 = pnand %p873_p2, %p1078_p8 }
  0xf2   : > { %980 = dma.done.wait (!%p870_p3), %s747_s15, 8192  }
  0xf3   : > { %982 = vsyncadd (!%p870_p3), %s747_s15, 4294959104  ;;  %s16_s17 = sadd.s32 1, %s1005_s17   ;;  %s1965_s12 = smov %s989_s13 }
  0xf4   : > { %p13_p5 = scmp.ge.s32.totalorder %s16_s17, 4   ;;  %s1966_s13 = smov %s993_s14 }
  0xf5   : > { %s1967_s14 = smov %s1084_s25  ;;  %s1968_s15 = smov %s1001_s16 }
  0xf6   : > { %s1969_s16 = smov %s1971_s20  ;;  %15 = sbr.rel (!%p13_p5) target bundleno = 4 (0x4), region = 73 }
  0xfd   :  { %752 = vsyncpa [#allocation3], 1 }
  0xfe   :  { %754 = vsyncpa [#allocation3 + $0x1], 1 }

// kernel: permute3d_conv_block.2
= control target key start
LH: loop header
LB: loop body
LE: loop exit
PB: predicated region body
PF: predicated region fallthrough
CT: control target
= control target key end

     0   :  { %s2033_s0 = inlined_call_operand.vmem [shape: bf16[2,10,16,122], index: 0, kind: input, shape index: {}, may-alias: {0,1,2}]   ;;  %s2034_s1 = inlined_call_operand.vmem [shape: bf16[2,10,16,122], index: 1, kind: input, shape index: {}, may-alias: {0,1,2}]   ;;  %s2035_s2 = inlined_call_operand.vmem [shape: bf16[2,10,16,122], index: 2, kind: input, shape index: {}, may-alias: {0,1,2}]   ;;  %s2036_s3 = inlined_call_operand.vmem [shape: bf16[3,8,144], index: 3, kind: input, shape index: {}]   ;;  %s2037_s4 = inlined_call_operand.vmem [shape: f32[2,8,8,8,8], index: 4, kind: output, shape index: {0}]   ;;  %s2038_s5 = inlined_call_operand.vmem [shape: f32[2,8,8,2], index: 5, kind: output, shape index: {1}]  }
   0x1   :  { %2049 = sst [smem:[#allocation7_spill]] %s2033_s0 }
   0x2   :  { %s1514_s18 = smov 0   ;;  %s1516_s19 = smov 0  }
   0x3   :  { %s1518_s20 = smov 0   ;;  %s1520_s21 = smov 0  }
   0x4   :  { %s1522_s22 = smov 0   ;;  %s1524_s23 = smov 0  }
   0x5   :  { %s1526_s24 = smov 0  }
   0x6 LB: > { %2050 = sst [smem:[#allocation3_spill]] %s1458_s22  ;;  %s25_s25 = sadd.s32 1, %s1458_s22  ;;  %s1466_s24 = sphi %s1526_s24, %s16_s24   ;;  %s1462_s23 = sphi %s1524_s23, %s2062_s23   ;;  %s1458_s22 = sphi %s1522_s22, %s2061_s22   ;;  %s1454_s21 = sphi %s1520_s21, %s2060_s21   ;;  %s1450_s20 = sphi %s1518_s20, %s2059_s20   ;;  %s1446_s19 = sphi %s1516_s19, %s2064_s19   ;;  %s1442_s18 = sphi %s1514_s18, %s2063_s18  }
   0x7   : > { %2051 = sst [smem:[#allocation4_spill]] %s1462_s23  ;;  %p26_p0 = scmp.ge.s32.totalorder %s25_s25, 8 }
   0x8   : > { %s28_s26 = sadd.s32 1, %s1462_s23  ;;  %s1292_s27 = sadd.s32 4294967295, %s1466_s24  }
   0x9   : > { %p156_p1 = scmp.ne.s32.totalorder %s1446_s19, %s1442_s18  ;;  %s2066_s25 = smov (%p26_p0, %s25_s25), 0 }
   0xa   : > { %2052 = sst [smem:[#allocation5_spill]] %s2066_s25  ;;  %s2068_s26 = smov (!%p26_p0, %s28_s26), %s1462_s23 }
   0xb   : > { %s142_s28 = ssub.s32 %s1458_s22, %s2066_s25  ;;  %p157_p2 = scmp.eq.s32.totalorder %s1292_s27, 15 }
   0xc   : > { %p30_p3 = scmp.ge.s32.totalorder %s2068_s26, 2  ;;  %p1296_p4 = scmp.ge.s32.totalorder %s1466_s24, 1 }
   0xd   : > { %p1560_p5 = por %p157_p2, %p156_p1  ;;  %p252_p6 = scmp.lt.s32.totalorder %s1466_s24, 17 }
   0xe   : > { %s2070_s26 = smov (%p30_p3, %s2068_s26), 0  ;;  %s146_s7 = sadd.s32 1, %s1446_s19 }
   0xf   : > { %2054 = sst [smem:[#allocation6_spill]] %s2070_s26  ;;  %p253_p7 = pnand %p1296_p4, %p252_p6 }
  0x10   : > { %s141_s30 = ssub.s32 %s1462_s23, %s2070_s26  ;;  %p311_p9 = scmp.lt.s32.totalorder (!%p253_p7), %s1454_s21, 1  ;;  %v1468_v0 = vmov (!%p253_p7), 0   ;;  %v1603_v3 = vld [vmem:[%s2036_s3] sm:$0xff] (!%p253_p7)  ;;  %vm424_vm0 = vcmask (!%p253_p7), 130048   ;;  %v1621_v6 = vld [vmem:[%s2036_s3 + $0x8] sm:$0xff] (!%p253_p7)  ;;  %v1316_v24 = vld [vmem:[%s2036_s3 + $0x10] sm:$0xff] (!%p253_p7)  ;;  %v606_v43 = vlaneseq (!%p253_p7) }
  0x11   : > { %s143_s6 = sor.u32 %s142_s28, %s141_s30  ;;  %256 = sbr.rel (%p253_p7) target bundleno = 844 (0x34c), region = 36  ;;  %477 = vmatprep.subr.bf16.mxu0 (!%p253_p7), %v1468_v0  ;;  %428 = vmatprep.subr.bf16.mxu1 (!%p253_p7), %v1468_v0  ;;  %v1313_v4 = vcombine.high (!%p253_p7), %v1603_v3, %v1603_v3  ;;  %v1310_v7 = vcombine.high (!%p253_p7), %v1621_v6, %v1621_v6  ;;  %v1312_v22 = vcombine.low (!%p253_p7), %v1603_v3, %v1603_v3  ;;  %v1477_v41 = vmov (!%p253_p7), 1966171168  }
  0x12   : > { %p144_p8 = scmp.eq.s32.totalorder %s143_s6, 0  ;;  %p313_p10 = scmp.lt.s32.totalorder (!%p253_p7), %s1450_s20, 9  ;;  %v1318_v25 = vcombine.high (!%p253_p7), %v1316_v24, %v1316_v24  ;;  %v1309_v30 = vcombine.low (!%p253_p7), %v1621_v6, %v1621_v6  ;;  %v1317_v36 = vcombine.low (!%p253_p7), %v1316_v24, %v1316_v24  ;;  %v604_v42 = vunpack.c.l.s4 (!%p253_p7), %v1477_v41 }
  0x13   : > { %s2055_s0 = sld [smem:[#allocation7_spill]] (!%p253_p7)  ;;  %s320_s27 = sadd.s32 (!%p253_p7), 1, %s1450_s20  ;;  %1314 = vmatprep.mubr.msk.bf16.mxu0 (!%p253_p7), %vm424_vm0, %v1313_v4  ;;  %1311 = vmatprep.mubr.msk.bf16.mxu1 (!%p253_p7), %vm424_vm0, %v1310_v7  ;;  %v607_v45 = vshrl.u32 (!%p253_p7), %v606_v43, 7  ;;  %vm719_vm1 = vcmask (!%p253_p7), 64512   ;;  %vm707_vm2 = vcmask (!%p253_p7), 57344   ;;  %vm1055_vm3 = vcmask (!%p253_p7), 7168  }
  0x14   : > { %s1571_s8 = scalar_select %p144_p8, %s1446_s19, %s146_s7  }
  0x15   : > { %s331_s28 = sadd.s32 (!%p253_p7), 2, %s1450_s20  ;;  %s2041_s30 = smov (!%p253_p7), 127   ;;  %v605_v44 = vunpack.c.0.s8 (!%p253_p7), %v604_v42  ;;  %v653_v56 = vsub.s32 (!%p253_p7), 0, %v607_v45  ;;  %vm1057_vm4 = vcmask (!%p253_p7), 15360  }
  0x16   : > { %s2039_s6 = smov (!%p253_p7), 118   ;;  %p323_p11 = scmp.lt.s32.totalorder (!%p253_p7), %s320_s27, 9 }
  0x17   : > { %p334_p12 = scmp.lt.s32.totalorder (!%p253_p7), %s331_s28, 9  ;;  %s2047_s7 = smov (!%p253_p7), 126   ;;  %v608_v46 = vsub.s32 (!%p253_p7), %v605_v44, %v607_v45 }
  0x18   : > { %s1578_s9 = scalar_select %p311_p9, %s1454_s21, 1 }
  0x19   : > { %s314_s10 = scalar_select %p313_p10, %s1450_s20, 9 }
  0x1a   : > { %s1330_s11 = smul.u32 20, %s1578_s9  ;;  %s2072_s27 = smov (!%p323_p11, %s320_s27), 9 }
  0x1b   : > { %s1298_s12 = sshll.u32 %s314_s10, 1  ;;  %s2074_s28 = smov (!%p334_p12, %s331_s28), 9 }
  0x1c   : > { %s317_s13 = sadd.s32 %s1330_s11, %s1298_s12  ;;  %s1472_s10 = smov 117  }
  0x1d   : > { %s1299_s14 = sshll.u32 %s317_s13, 2  ;;  %s1300_s12 = sshll.u32 %s2072_s27, 1 }
  0x1e   : > { %s319_s17 = scalar_lea.vmem %s2055_s0, %s1299_s14  ;;  %s327_s13 = sadd.s32 %s1330_s11, %s1300_s12 }
  0x1f   : > { %v1403_v1 = vld [vmem:[%s319_s17] sm:$0xff]   ;;  %s1302_s14 = sshll.u32 %s2074_s28, 1  ;;  %s1301_s15 = sshll.u32 %s327_s13, 2 }
  0x20   : > { %359 = vrot.lane.b32.xlu0 %v1403_v1, %s2041_s30  ;;  %365 = vrot.lane.b32.xlu1 %v1403_v1, %s2039_s6  ;;  %s338_s16 = sadd.s32 %s1330_s11, %s1302_s14  ;;  %s329_s30 = scalar_lea.vmem %s2034_s1, %s1301_s15 }
  0x21   : > { %478 = vmatpush1.bf16.msra.mxu0 %v1403_v1  ;;  %s1303_s0 = sshll.u32 %s338_s16, 2  ;;  %s1473_s26 = smov 116   ;;  %v1404_v2 = vld [vmem:[%s329_s30] sm:$0xff]  }
  0x22   : > { %479 = vmatprep.subr.bf16.mxu0 %v1468_v0  ;;  %s1474_s25 = smov 108   ;;  %429 = vmatpush1.bf16.msra.mxu1 %v1404_v2  ;;  %s1475_s27 = smov 107  }
  0x23   : > { %s1476_s28 = smov 106   ;;  %430 = vmatprep.subr.bf16.mxu1 %v1468_v0  ;;  %s2056_s12 = smov 127  }
  0x24   : > { %362 = vrot.lane.b32.xlu0 %v1403_v1, %s2047_s7  ;;  %368 = vrot.lane.b32.xlu1 %v1403_v1, %s1472_s10  ;;  %s340_s7 = scalar_lea.vmem %s2035_s2, %s1303_s0  ;;  %s2057_s13 = smov 126  }
  0x25   : > { %s2058_s0 = smov 118   ;;  %v1405_v5 = vld [vmem:[%s340_s7] sm:$0xff]   ;;  %s1478_s30 = smov 47  }
  0x26   : > { %s1479_s7 = smov 57   ;;  %s1480_s14 = smov 97  }
  0x27   : > { %s1481_s15 = smov 87   ;;  %s1482_s16 = smov 77  }
  0x28   : > { %371 = vrot.lane.b32.xlu0 %v1403_v1, %s1473_s26  ;;  %374 = vrot.lane.b32.xlu1 %v1403_v1, %s1474_s25  ;;  %s1483_s17 = smov 67   ;;  %p344_p13 = scmp.lt.s32.totalorder %s1450_s20, 7 }
  0x2c   : > { %377 = vrot.lane.b32.xlu0 %v1403_v1, %s1475_s27  ;;  %380 = vrot.lane.b32.xlu1 %v1403_v1, %s1476_s28 }
  0x30   : > { %392 = vrot.lane.b32.xlu0 %v1404_v2, %s2056_s12  ;;  %395 = vrot.lane.b32.xlu1 %v1404_v2, %s2057_s13 }
  0x34   : > { %398 = vrot.lane.b32.xlu0 %v1404_v2, %s2058_s0  ;;  %401 = vrot.lane.b32.xlu1 %v1404_v2, %s1472_s10 }
  0x38   : > { %404 = vrot.lane.b32.xlu0 %v1404_v2, %s1473_s26  ;;  %407 = vrot.lane.b32.xlu1 %v1404_v2, %s1474_s25 }
  0x3c   : > { %410 = vrot.lane.b32.xlu0 %v1404_v2, %s1475_s27  ;;  %413 = vrot.lane.b32.xlu1 %v1404_v2, %s1476_s28 }
  0x40   : > { %525 = vrot.lane.b32.xlu0 %v1405_v5, %s2056_s12  ;;  %528 = vrot.lane.b32.xlu1 %v1405_v5, %s2057_s13 }
  0x44   : > { %531 = vrot.lane.b32.xlu0 %v1405_v5, %s2058_s0  ;;  %534 = vrot.lane.b32.xlu1 %v1405_v5, %s1472_s10 }
  0x48   : > { %537 = vrot.lane.b32.xlu0 %v1405_v5, %s1473_s26  ;;  %540 = vrot.lane.b32.xlu1 %v1405_v5, %s1474_s25 }
  0x4c   : > { %543 = vrot.lane.b32.xlu0 %v1405_v5, %s1475_s27  ;;  %546 = vrot.lane.b32.xlu1 %v1405_v5, %s1476_s28  ;;  %s298_s28 = sand.u32 1, %s1442_s18  }
  0x4d   : > { %s1297_s11 = sshll.u32 %s298_s28, 6 }
  0x4e   : > { %s1793_s18 = scalar_lea.vmem [#allocation2], %s1297_s11 }
  0x92   : > { %v360_v8 = vpop.permute.xlu0 %359  ;;  %v366_v9 = vpop.permute.xlu1 %365 }
  0x93   : > { %480 = vmatpush1.bf16.msra.mxu0 %v360_v8 }
  0x94   : > { %481 = vmatprep.subr.bf16.mxu0 %v1468_v0 }
  0x96   : > { %v363_v10 = vpop.permute.xlu0 %362  ;;  %v369_v11 = vpop.permute.xlu1 %368 }
  0x97   : > { %482 = vmatpush1.bf16.msra.mxu0 %v363_v10 }
  0x98   : > { %483 = vmatprep.subr.bf16.mxu0 %v1468_v0 }
  0x9a   : > { %v372_v12 = vpop.permute.xlu0 %371  ;;  %v375_v13 = vpop.permute.xlu1 %374 }
  0x9b   : > { %484 = vmatpush1.bf16.msra.mxu0 %v366_v9 }
  0x9c   : > { %485 = vmatprep.subr.bf16.mxu0 %v1468_v0 }
  0x9e   : > { %v378_v14 = vpop.permute.xlu0 %377  ;;  %v381_v15 = vpop.permute.xlu1 %380 }
  0x9f   : > { %486 = vmatpush1.bf16.msra.mxu0 %v369_v11 }
  0xa0   : > { %487 = vmatprep.subr.bf16.mxu0 %v1468_v0 }
  0xa2   : > { %v393_v16 = vpop.permute.xlu0 %392  ;;  %v396_v17 = vpop.permute.xlu1 %395 }
  0xa3   : > { %431 = vmatpush1.bf16.msra.mxu1 %v393_v16  ;;  %488 = vmatpush1.bf16.msra.mxu0 %v372_v12 }
  0xa4   : > { %432 = vmatprep.subr.bf16.mxu1 %v1468_v0  ;;  %489 = vmatprep.subr.bf16.mxu0 %v1468_v0 }
  0xa6   : > { %v399_v18 = vpop.permute.xlu0 %398  ;;  %v402_v19 = vpop.permute.xlu1 %401 }
  0xa7   : > { %433 = vmatpush1.bf16.msra.mxu1 %v396_v17  ;;  %490 = vmatpush1.bf16.msra.mxu0 %v375_v13 }
  0xa8   : > { %434 = vmatprep.subr.bf16.mxu1 %v1468_v0  ;;  %491 = vmatprep.subr.bf16.mxu0 %v1468_v0 }
  0xaa   : > { %v405_v20 = vpop.permute.xlu0 %404  ;;  %v408_v21 = vpop.permute.xlu1 %407 }
  0xab   : > { %435 = vmatpush1.bf16.msra.mxu1 %v399_v18  ;;  %492 = vmatpush1.bf16.msra.mxu0 %v378_v14 }
  0xac   : > { %436 = vmatprep.subr.bf16.mxu1 %v1468_v0  ;;  %493 = vmatprep.subr.bf16.mxu0 %v1468_v0 }
  0xae   : > { %v411_v23 = vpop.permute.xlu0 %410  ;;  %v414_v26 = vpop.permute.xlu1 %413 }
  0xaf   : > { %437 = vmatpush1.bf16.msra.mxu1 %v402_v19  ;;  %494 = vmatpush1.bf16.msra.mxu0 %v381_v15 }
  0xb0   : > { %438 = vmatprep.subr.bf16.mxu1 %v1468_v0  ;;  %560 = vmatprep.subr.bf16.mxu0 %v1468_v0 }
  0xb2   : > { %510 = vmatmul.mubr.bf16.vlgmr.msra.gmra.mrb[0].mxu0 %v1312_v22  ;;  %v526_v27 = vpop.permute.xlu0 %525  ;;  %v529_v28 = vpop.permute.xlu1 %528 }
  0xb3   : > { %439 = vmatpush1.bf16.msra.mxu1 %v405_v20  ;;  %561 = vmatpush1.bf16.msra.mxu0 %v1405_v5 }
  0xb4   : > { %440 = vmatprep.subr.bf16.mxu1 %v1468_v0  ;;  %562 = vmatprep.subr.bf16.mxu0 %v1468_v0 }
  0xb5   : > { %1319 = vmatprep.mubr.msk.bf16.mxu0 %vm424_vm0, %v1318_v25 }
  0xb6   : > { %v532_v29 = vpop.permute.xlu0 %531  ;;  %v535_v31 = vpop.permute.xlu1 %534 }
  0xb7   : > { %441 = vmatpush1.bf16.msra.mxu1 %v408_v21  ;;  %563 = vmatpush1.bf16.msra.mxu0 %v526_v27 }
  0xb8   : > { %442 = vmatprep.subr.bf16.mxu1 %v1468_v0  ;;  %564 = vmatprep.subr.bf16.mxu0 %v1468_v0 }
  0xba   : > { %v538_v32 = vpop.permute.xlu0 %537  ;;  %v541_v33 = vpop.permute.xlu1 %540 }
  0xbb   : > { %443 = vmatpush1.bf16.msra.mxu1 %v411_v23  ;;  %565 = vmatpush1.bf16.msra.mxu0 %v529_v28 }
  0xbc   : > { %444 = vmatprep.subr.bf16.mxu1 %v1468_v0  ;;  %566 = vmatprep.subr.bf16.mxu0 %v1468_v0 }
  0xbe   : > { %v544_v34 = vpop.permute.xlu0 %543  ;;  %v547_v35 = vpop.permute.xlu1 %546 }
  0xbf   : > { %445 = vmatpush1.bf16.msra.mxu1 %v414_v26  ;;  %567 = vmatpush1.bf16.msra.mxu0 %v532_v29 }
  0xc0   : > { %568 = vmatprep.subr.bf16.mxu0 %v1468_v0 }
  0xc2   : > { %461 = vmatmul.mubr.bf16.vlgmr.msra.gmra.mrb[0].mxu1 %v1309_v30 }
  0xc3   : > { %569 = vmatpush1.bf16.msra.mxu0 %v535_v31 }
  0xc4   : > { %570 = vmatprep.subr.bf16.mxu0 %v1468_v0 }
  0xc7   : > { %571 = vmatpush1.bf16.msra.mxu0 %v538_v32 }
  0xc8   : > { %572 = vmatprep.subr.bf16.mxu0 %v1468_v0 }
  0xcb   : > { %573 = vmatpush1.bf16.msra.mxu0 %v541_v33 }
  0xcc   : > { %574 = vmatprep.subr.bf16.mxu0 %v1468_v0 }
  0xcf   : > { %575 = vmatpush1.bf16.msra.mxu0 %v544_v34 }
  0xd0   : > { %576 = vmatprep.subr.bf16.mxu0 %v1468_v0 }
  0xd3   : > { %577 = vmatpush1.bf16.msra.mxu0 %v547_v35 }
  0xd6   : > { %593 = vmatmul.mubr.bf16.vlgmr.msra.gmra.mrb[0].mxu0 %v1317_v36 }
 0x195   : > { %v462_v37 = vpop.f32.mrb[0].mxu1 }
 0x196   : > { %v464_v38 = vpop.f32.mrb[1].mxu1 }
 0x197   : > { %v465_v39 = vpop.f32.mrb[2].mxu1 }
 0x198   : > { %v466_v40 = vpop.f32.mrb[3].mxu1 }
 0x1a9   : > { %v594_v47 = vpop.f32.mrb[0].mxu0 }
 0x1aa   : > { %v1325_v48 = vadd.f32 %v594_v47, %v462_v37  ;;  %v596_v49 = vpop.f32.mrb[1].mxu0 }
 0x1ab   : > { %v597_v50 = vpop.f32.mrb[2].mxu0 }
 0x1ac   : > { %1041 = vrot.lane.b32.xlu1 %v1325_v48, %s1478_s30  ;;  %716 = vrot.lane.b32.xlu0 %v1325_v48, %s1472_s10  ;;  %v598_v51 = vpop.f32.mrb[3].mxu0  ;;  %v609_v52 = vrot.slane %v1325_v48, %v608_v46  ;;  %v602_v53 = vcombine.high %v1325_v48, %v1325_v48  ;;  %v724_v54 = vmul.f32 %v1325_v48, %v1325_v48 }
 0x1ae   : > { %v625_v55 = vrot.slane %v609_v52, %v608_v46  ;;  %v616_v57 = vrot.slane %v602_v53, %v608_v46  ;;  %v617_v2 = vcombine.high %v609_v52, %v609_v52 }
 0x1b0   : > { %765 = vrot.lane.b32.xlu0 %v1325_v48, %s1475_s27  ;;  %1002 = vrot.lane.b32.xlu1 %v724_v54, %s1479_s7  ;;  %v632_v58 = vrot.slane %v616_v57, %v608_v46  ;;  %v618_v59 = vcombine.high %v616_v57, %v616_v57  ;;  %v1661_v60 = vrot.slane %v625_v55, %v653_v56 }
 0x1b1   : > { %v639_v3 = vrot.slane %v617_v2, %v608_v46  ;;  %v647_v5 = vcombine.high %v625_v55, %v625_v55 }
 0x1b2   : > { %v646_v61 = vrot.slane %v618_v59, %v608_v46  ;;  %v648_v62 = vcombine.high %v632_v58, %v632_v58  ;;  %v1717_v9 = vrot.slane %v632_v58, %v653_v56 }
 0x1b3   : > { %v1685_v4 = vrot.slane %v639_v3, %v653_v56  ;;  %v1690_v6 = vrot.slane %v647_v5, %v653_v56  ;;  %v649_v7 = vcombine.high %v639_v3, %v639_v3 }
 0x1b4   : > { %811 = vrot.lane.b32.xlu0 %v1325_v48, %s1480_s14  ;;  %733 = vrot.lane.b32.xlu1 %v1661_v60, %s1475_s27  ;;  %v1666_v63 = vrot.slane %v648_v62, %v653_v56  ;;  %v650_v0 = vcombine.high %v646_v61, %v646_v61  ;;  %v1719_v10 = vrot.slane %v646_v61, %v653_v56 }
 0x1b5   : > { %v1711_v8 = vrot.slane %v649_v7, %v653_v56 }
 0x1b6   : > { %v1668_v1 = vrot.slane %v650_v0, %v653_v56 }
 0x1b8   : > { %857 = vrot.lane.b32.xlu0 %v1325_v48, %s1481_s15  ;;  %779 = vrot.lane.b32.xlu1 %v1661_v60, %s1480_s14 }
 0x1bc   : > { %903 = vrot.lane.b32.xlu0 %v1325_v48, %s1482_s16  ;;  %825 = vrot.lane.b32.xlu1 %v1661_v60, %s1481_s15 }
 0x1c0   : > { %949 = vrot.lane.b32.xlu0 %v1325_v48, %s1483_s17  ;;  %871 = vrot.lane.b32.xlu1 %v1661_v60, %s1482_s16 }
 0x1c4   : > { %995 = vrot.lane.b32.xlu0 %v1325_v48, %s1479_s7  ;;  %917 = vrot.lane.b32.xlu1 %v1661_v60, %s1483_s17 }
 0x1c8   : > { %726 = vrot.lane.b32.xlu0 %v724_v54, %s1472_s10  ;;  %963 = vrot.lane.b32.xlu1 %v1661_v60, %s1479_s7 }
 0x1cc   : > { %772 = vrot.lane.b32.xlu0 %v724_v54, %s1475_s27  ;;  %685 = vrot.lane.b32.xlu1 %v1685_v4, %s1472_s10 }
 0x1d0   : > { %818 = vrot.lane.b32.xlu0 %v724_v54, %s1480_s14  ;;  %737 = vrot.lane.b32.xlu1 %v1690_v6, %s1475_s27 }
 0x1d4   : > { %864 = vrot.lane.b32.xlu0 %v724_v54, %s1481_s15  ;;  %783 = vrot.lane.b32.xlu1 %v1690_v6, %s1480_s14 }
 0x1d8   : > { %910 = vrot.lane.b32.xlu0 %v724_v54, %s1482_s16  ;;  %829 = vrot.lane.b32.xlu1 %v1690_v6, %s1481_s15 }
 0x1dc   : > { %956 = vrot.lane.b32.xlu0 %v724_v54, %s1483_s17  ;;  %875 = vrot.lane.b32.xlu1 %v1690_v6, %s1482_s16 }
 0x1e0   : > { %1048 = vrot.lane.b32.xlu0 %v724_v54, %s1478_s30  ;;  %921 = vrot.lane.b32.xlu1 %v1690_v6, %s1483_s17 }
 0x1e4   : > { %683 = vrot.lane.b32.xlu0 %v1661_v60, %s1472_s10  ;;  %965 = vrot.lane.b32.xlu1 %v1685_v4, %s1479_s7 }
 0x1e8   : > { %687 = vrot.lane.b32.xlu0 %v1690_v6, %s1472_s10  ;;  %689 = vrot.lane.b32.xlu1 %v1711_v8, %s1472_s10 }
 0x1ec   : > { %691 = vrot.lane.b32.xlu0 %v1717_v9, %s1472_s10  ;;  %693 = vrot.lane.b32.xlu1 %v1719_v10, %s1472_s10 }
 0x1f0   : > { %735 = vrot.lane.b32.xlu0 %v1685_v4, %s1475_s27  ;;  %739 = vrot.lane.b32.xlu1 %v1711_v8, %s1475_s27 }
 0x1f4   : > { %741 = vrot.lane.b32.xlu0 %v1717_v9, %s1475_s27  ;;  %743 = vrot.lane.b32.xlu1 %v1719_v10, %s1475_s27 }
 0x1f8   : > { %781 = vrot.lane.b32.xlu0 %v1685_v4, %s1480_s14  ;;  %785 = vrot.lane.b32.xlu1 %v1711_v8, %s1480_s14 }
 0x1fc   : > { %787 = vrot.lane.b32.xlu0 %v1717_v9, %s1480_s14  ;;  %789 = vrot.lane.b32.xlu1 %v1719_v10, %s1480_s14 }
 0x200   : > { %827 = vrot.lane.b32.xlu0 %v1685_v4, %s1481_s15  ;;  %831 = vrot.lane.b32.xlu1 %v1711_v8, %s1481_s15 }
 0x204   : > { %833 = vrot.lane.b32.xlu0 %v1717_v9, %s1481_s15  ;;  %835 = vrot.lane.b32.xlu1 %v1719_v10, %s1481_s15 }
 0x208   : > { %873 = vrot.lane.b32.xlu0 %v1685_v4, %s1482_s16  ;;  %877 = vrot.lane.b32.xlu1 %v1711_v8, %s1482_s16 }
 0x20c   : > { %879 = vrot.lane.b32.xlu0 %v1717_v9, %s1482_s16  ;;  %881 = vrot.lane.b32.xlu1 %v1719_v10, %s1482_s16 }
 0x210   : > { %919 = vrot.lane.b32.xlu0 %v1685_v4, %s1483_s17  ;;  %923 = vrot.lane.b32.xlu1 %v1711_v8, %s1483_s17 }
 0x214   : > { %925 = vrot.lane.b32.xlu0 %v1717_v9, %s1483_s17  ;;  %927 = vrot.lane.b32.xlu1 %v1719_v10, %s1483_s17 }
 0x218   : > { %967 = vrot.lane.b32.xlu0 %v1690_v6, %s1479_s7  ;;  %969 = vrot.lane.b32.xlu1 %v1711_v8, %s1479_s7 }
 0x21c   : > { %971 = vrot.lane.b32.xlu0 %v1717_v9, %s1479_s7  ;;  %973 = vrot.lane.b32.xlu1 %v1719_v10, %s1479_s7 }
 0x21e   : > { %v1042_v11 = vpop.permute.xlu1 %1041  ;;  %v1773_v12 = vpop.permute.xlu0 %716 }
 0x21f   : > { %v1777_v13 = vsel %vm719_vm1, %v1042_v11, 0.0  ;;  %v720_v47 = vsel %vm719_vm1, %v1773_v12, 0.0 }
 0x220   : > { %695 = vrot.lane.b32.xlu0 %v1666_v63, %s1472_s10  ;;  %697 = vrot.lane.b32.xlu1 %v1668_v1, %s1472_s10  ;;  %s345_s10 = scalar_select %p344_p13, %s1450_s20, 7 }
 0x222   : > { %v1783_v14 = vpop.permute.xlu0 %765  ;;  %v1785_v15 = vpop.permute.xlu1 %1002 }
 0x223   : > { %v768_v51 = vsel %vm719_vm1, %v1783_v14, 0.0 }
 0x224   : > { %745 = vrot.lane.b32.xlu0 %v1666_v63, %s1475_s27  ;;  %747 = vrot.lane.b32.xlu1 %v1668_v1, %s1475_s27  ;;  %s1304_s27 = sshll.u32 %s1578_s9, 3  ;;  %s1321_s9 = sshll.u32 (%p1560_p5), %s1454_s21, 6 }
 0x225   : > { %s347_s6 = sadd.s32 %s1304_s27, %s345_s10  ;;  %s1075_s23 = sadd.s32 (%p1560_p5), %s1450_s20, %s1321_s9 }
 0x226   : > { %v1791_v16 = vpop.permute.xlu0 %811  ;;  %v734_v17 = vpop.permute.xlu1 %733  ;;  %s1305_s12 = sshll.u32 %s347_s6, 3  ;;  %s1322_s29 = sshll.u32 (%p1560_p5), %s1075_s23, 3 }
 0x227   : > { %757 = vst.msk [vmem:[%s1793_s18 + $0x1] sm:$0x1] %vm707_vm2, %v734_v17  ;;  %v814_v55 = vsel %vm719_vm1, %v1791_v16, 0.0  ;;  %v1005_v16 = vsel %vm719_vm1, %v1785_v15, 0.0  ;;  %s349_s22 = scalar_lea.vmem %s2038_s5, %s1305_s12 }
 0x228   : > { %791 = vrot.lane.b32.xlu0 %v1666_v63, %s1480_s14  ;;  %793 = vrot.lane.b32.xlu1 %v1668_v1, %s1480_s14 }
 0x22a   : > { %v1801_v18 = vpop.permute.xlu0 %857  ;;  %v780_v19 = vpop.permute.xlu1 %779 }
 0x22b   : > { %803 = vst.msk [vmem:[%s1793_s18 + $0x2] sm:$0x1] %vm707_vm2, %v780_v19  ;;  %v860_v59 = vsel %vm719_vm1, %v1801_v18, 0.0 }
 0x22c   : > { %837 = vrot.lane.b32.xlu0 %v1666_v63, %s1481_s15  ;;  %839 = vrot.lane.b32.xlu1 %v1668_v1, %s1481_s15 }
 0x22e   : > { %v1809_v20 = vpop.permute.xlu0 %903  ;;  %v826_v21 = vpop.permute.xlu1 %825 }
 0x22f   : > { %849 = vst.msk [vmem:[%s1793_s18 + $0x3] sm:$0x1] %vm707_vm2, %v826_v21  ;;  %v906_v2 = vsel %vm719_vm1, %v1809_v20, 0.0 }
 0x230   : > { %883 = vrot.lane.b32.xlu0 %v1666_v63, %s1482_s16  ;;  %885 = vrot.lane.b32.xlu1 %v1668_v1, %s1482_s16 }
 0x232   : > { %v1817_v22 = vpop.permute.xlu0 %949  ;;  %v872_v23 = vpop.permute.xlu1 %871 }
 0x233   : > { %895 = vst.msk [vmem:[%s1793_s18 + $0x4] sm:$0x1] %vm707_vm2, %v872_v23  ;;  %v952_v11 = vsel %vm719_vm1, %v1817_v22, 0.0 }
 0x234   : > { %929 = vrot.lane.b32.xlu0 %v1666_v63, %s1483_s17  ;;  %931 = vrot.lane.b32.xlu1 %v1668_v1, %s1483_s17 }
 0x236   : > { %v996_v24 = vpop.permute.xlu0 %995  ;;  %v918_v25 = vpop.permute.xlu1 %917 }
 0x237   : > { %941 = vst.msk [vmem:[%s1793_s18 + $0x5] sm:$0x1] %vm707_vm2, %v918_v25  ;;  %v998_v43 = vsel %vm719_vm1, %v996_v24, 0.0 }
 0x238   : > { %975 = vrot.lane.b32.xlu0 %v1666_v63, %s1479_s7  ;;  %977 = vrot.lane.b32.xlu1 %v1668_v1, %s1479_s7 }
 0x23a   : > { %v727_v26 = vpop.permute.xlu0 %726  ;;  %v964_v27 = vpop.permute.xlu1 %963 }
 0x23b   : > { %987 = vst.msk [vmem:[%s1793_s18 + $0x6] sm:$0x1] %vm707_vm2, %v964_v27  ;;  %v729_v44 = vsel %vm719_vm1, %v727_v26, 0.0 }
 0x23e   : > { %v773_v28 = vpop.permute.xlu0 %772  ;;  %v686_v29 = vpop.permute.xlu1 %685 }
 0x23f   : > { %709 = vst.msk [vmem:[%s1793_s18 + $0x8] sm:$0x1] %vm707_vm2, %v686_v29  ;;  %v775_v48 = vsel %vm719_vm1, %v773_v28, 0.0 }
 0x242   : > { %v819_v30 = vpop.permute.xlu0 %818  ;;  %v738_v31 = vpop.permute.xlu1 %737 }
 0x243   : > { %759 = vst.msk [vmem:[%s1793_s18 + $0x11] sm:$0x1] %vm707_vm2, %v738_v31  ;;  %v821_v52 = vsel %vm719_vm1, %v819_v30, 0.0 }
 0x246   : > { %v865_v32 = vpop.permute.xlu0 %864  ;;  %v784_v33 = vpop.permute.xlu1 %783 }
 0x247   : > { %805 = vst.msk [vmem:[%s1793_s18 + $0x12] sm:$0x1] %vm707_vm2, %v784_v33  ;;  %v867_v56 = vsel %vm719_vm1, %v865_v32, 0.0 }
 0x24a   : > { %v911_v34 = vpop.permute.xlu0 %910  ;;  %v830_v35 = vpop.permute.xlu1 %829 }
 0x24b   : > { %851 = vst.msk [vmem:[%s1793_s18 + $0x13] sm:$0x1] %vm707_vm2, %v830_v35  ;;  %v913_v61 = vsel %vm719_vm1, %v911_v34, 0.0 }
 0x24e   : > { %v957_v36 = vpop.permute.xlu0 %956  ;;  %v876_v37 = vpop.permute.xlu1 %875 }
 0x24f   : > { %897 = vst.msk [vmem:[%s1793_s18 + $0x14] sm:$0x1] %vm707_vm2, %v876_v37  ;;  %v959_v3 = vsel %vm719_vm1, %v957_v36, 0.0 }
 0x252   : > { %v1049_v38 = vpop.permute.xlu0 %1048  ;;  %v922_v39 = vpop.permute.xlu1 %921 }
 0x253   : > { %v1844_v40 = vsel %vm719_vm1, %v1049_v38, 0.0  ;;  %943 = vst.msk [vmem:[%s1793_s18 + $0x15] sm:$0x1] %vm707_vm2, %v922_v39 }
 0x256   : > { %v684_v41 = vpop.permute.xlu0 %683  ;;  %v966_v42 = vpop.permute.xlu1 %965 }
 0x257   : > { %708 = vst.msk [vmem:[%s1793_s18] sm:$0x1] %vm707_vm2, %v684_v41  ;;  %988 = vst.msk [vmem:[%s1793_s18 + $0xe] sm:$0x1] %vm707_vm2, %v966_v42  ;;  %999 = vadd.xlane.f32.xlu0 %v998_v43 }
 0x25a   : > { %v688_v45 = vpop.permute.xlu0 %687  ;;  %v690_v46 = vpop.permute.xlu1 %689 }
 0x25b   : > { %710 = vst.msk [vmem:[%s1793_s18 + $0x10] sm:$0x1] %vm707_vm2, %v688_v45  ;;  %711 = vst.msk [vmem:[%s1793_s18 + $0x18] sm:$0x1] %vm707_vm2, %v690_v46  ;;  %730 = vadd.xlane.f32.xlu0 %v729_v44 }
 0x25c   : > { %721 = vadd.xlane.f32.xlu1 %v720_v47 }
 0x25e   : > { %v692_v49 = vpop.permute.xlu0 %691  ;;  %v694_v50 = vpop.permute.xlu1 %693 }
 0x25f   : > { %712 = vst.msk [vmem:[%s1793_s18 + $0x20] sm:$0x1] %vm707_vm2, %v692_v49  ;;  %713 = vst.msk [vmem:[%s1793_s18 + $0x28] sm:$0x1] %vm707_vm2, %v694_v50  ;;  %776 = vadd.xlane.f32.xlu0 %v775_v48 }
 0x260   : > { %769 = vadd.xlane.f32.xlu1 %v768_v51 }
 0x262   : > { %v736_v53 = vpop.permute.xlu0 %735  ;;  %v740_v54 = vpop.permute.xlu1 %739 }
 0x263   : > { %758 = vst.msk [vmem:[%s1793_s18 + $0x9] sm:$0x1] %vm707_vm2, %v736_v53  ;;  %760 = vst.msk [vmem:[%s1793_s18 + $0x19] sm:$0x1] %vm707_vm2, %v740_v54  ;;  %822 = vadd.xlane.f32.xlu0 %v821_v52 }
 0x264   : > { %815 = vadd.xlane.f32.xlu1 %v814_v55 }
 0x266   : > { %v742_v57 = vpop.permute.xlu0 %741  ;;  %v744_v58 = vpop.permute.xlu1 %743 }
 0x267   : > { %761 = vst.msk [vmem:[%s1793_s18 + $0x21] sm:$0x1] %vm707_vm2, %v742_v57  ;;  %762 = vst.msk [vmem:[%s1793_s18 + $0x29] sm:$0x1] %vm707_vm2, %v744_v58  ;;  %868 = vadd.xlane.f32.xlu0 %v867_v56 }
 0x268   : > { %861 = vadd.xlane.f32.xlu1 %v860_v59 }
 0x26a   : > { %v782_v62 = vpop.permute.xlu0 %781  ;;  %v786_v0 = vpop.permute.xlu1 %785 }
 0x26b   : > { %804 = vst.msk [vmem:[%s1793_s18 + $0xa] sm:$0x1] %vm707_vm2, %v782_v62  ;;  %806 = vst.msk [vmem:[%s1793_s18 + $0x1a] sm:$0x1] %vm707_vm2, %v786_v0  ;;  %914 = vadd.xlane.f32.xlu0 %v913_v61 }
 0x26c   : > { %907 = vadd.xlane.f32.xlu1 %v906_v2 }
 0x26e   : > { %v788_v5 = vpop.permute.xlu0 %787  ;;  %v790_v7 = vpop.permute.xlu1 %789 }
 0x26f   : > { %807 = vst.msk [vmem:[%s1793_s18 + $0x22] sm:$0x1] %vm707_vm2, %v788_v5  ;;  %808 = vst.msk [vmem:[%s1793_s18 + $0x2a] sm:$0x1] %vm707_vm2, %v790_v7  ;;  %960 = vadd.xlane.f32.xlu0 %v959_v3 }
 0x270   : > { %953 = vadd.xlane.f32.xlu1 %v952_v11 }
 0x272   : > { %v828_v12 = vpop.permute.xlu0 %827  ;;  %v832_v14 = vpop.permute.xlu1 %831 }
 0x273   : > { %850 = vst.msk [vmem:[%s1793_s18 + $0xb] sm:$0x1] %vm707_vm2, %v828_v12  ;;  %852 = vst.msk [vmem:[%s1793_s18 + $0x1b] sm:$0x1] %vm707_vm2, %v832_v14 }
 0x274   : > { %1006 = vadd.xlane.f32.xlu1 %v1005_v16 }
 0x276   : > { %v834_v17 = vpop.permute.xlu0 %833  ;;  %v836_v18 = vpop.permute.xlu1 %835 }
 0x277   : > { %853 = vst.msk [vmem:[%s1793_s18 + $0x23] sm:$0x1] %vm707_vm2, %v834_v17  ;;  %854 = vst.msk [vmem:[%s1793_s18 + $0x2b] sm:$0x1] %vm707_vm2, %v836_v18 }
 0x27a   : > { %v874_v19 = vpop.permute.xlu0 %873  ;;  %v878_v20 = vpop.permute.xlu1 %877 }
 0x27b   : > { %896 = vst.msk [vmem:[%s1793_s18 + $0xc] sm:$0x1] %vm707_vm2, %v874_v19  ;;  %898 = vst.msk [vmem:[%s1793_s18 + $0x1c] sm:$0x1] %vm707_vm2, %v878_v20 }
 0x27e   : > { %v880_v15 = vpop.permute.xlu0 %879  ;;  %v882_v21 = vpop.permute.xlu1 %881 }
 0x27f   : > { %899 = vst.msk [vmem:[%s1793_s18 + $0x24] sm:$0x1] %vm707_vm2, %v880_v15  ;;  %900 = vst.msk [vmem:[%s1793_s18 + $0x2c] sm:$0x1] %vm707_vm2, %v882_v21 }
 0x282   : > { %v920_v22 = vpop.permute.xlu0 %919  ;;  %v924_v23 = vpop.permute.xlu1 %923 }
 0x283   : > { %942 = vst.msk [vmem:[%s1793_s18 + $0xd] sm:$0x1] %vm707_vm2, %v920_v22  ;;  %944 = vst.msk [vmem:[%s1793_s18 + $0x1d] sm:$0x1] %vm707_vm2, %v924_v23 }
 0x285   : > { %1009 = vrot.lane.b32.xlu0 %v1661_v60, %s1478_s30  ;;  %1011 = vrot.lane.b32.xlu1 %v1685_v4, %s1478_s30 }
 0x286   : > { %v926_v24 = vpop.permute.xlu0 %925  ;;  %v928_v25 = vpop.permute.xlu1 %927 }
 0x287   : > { %945 = vst.msk [vmem:[%s1793_s18 + $0x25] sm:$0x1] %vm707_vm2, %v926_v24  ;;  %946 = vst.msk [vmem:[%s1793_s18 + $0x2d] sm:$0x1] %vm707_vm2, %v928_v25 }
 0x289   : > { %1013 = vrot.lane.b32.xlu0 %v1690_v6, %s1478_s30 }
 0x28a   : > { %v968_v26 = vpop.permute.xlu0 %967  ;;  %v970_v27 = vpop.permute.xlu1 %969 }
 0x28b   : > { %989 = vst.msk [vmem:[%s1793_s18 + $0x16] sm:$0x1] %vm707_vm2, %v968_v26  ;;  %990 = vst.msk [vmem:[%s1793_s18 + $0x1e] sm:$0x1] %vm707_vm2, %v970_v27 }
 0x28e   : > { %v972_v60 = vpop.permute.xlu0 %971  ;;  %v974_v4 = vpop.permute.xlu1 %973 }
 0x28f   : > { %991 = vst.msk [vmem:[%s1793_s18 + $0x26] sm:$0x1] %vm707_vm2, %v972_v60  ;;  %992 = vst.msk [vmem:[%s1793_s18 + $0x2e] sm:$0x1] %vm707_vm2, %v974_v4 }
 0x292   : > { %v696_v28 = vpop.permute.xlu0 %695  ;;  %v698_v29 = vpop.permute.xlu1 %697 }
 0x293   : > { %714 = vst.msk [vmem:[%s1793_s18 + $0x30] sm:$0x1] %vm707_vm2, %v696_v28  ;;  %715 = vst.msk [vmem:[%s1793_s18 + $0x38] sm:$0x1] %vm707_vm2, %v698_v29 }
 0x296   : > { %v746_v6 = vpop.permute.xlu0 %745  ;;  %v748_v30 = vpop.permute.xlu1 %747 }
 0x297   : > { %763 = vst.msk [vmem:[%s1793_s18 + $0x31] sm:$0x1] %vm707_vm2, %v746_v6  ;;  %764 = vst.msk [vmem:[%s1793_s18 + $0x39] sm:$0x1] %vm707_vm2, %v748_v30 }
 0x29a   : > { %v792_v31 = vpop.permute.xlu0 %791  ;;  %v794_v32 = vpop.permute.xlu1 %793 }
 0x29b   : > { %809 = vst.msk [vmem:[%s1793_s18 + $0x32] sm:$0x1] %vm707_vm2, %v792_v31  ;;  %810 = vst.msk [vmem:[%s1793_s18 + $0x3a] sm:$0x1] %vm707_vm2, %v794_v32 }
 0x29e   : > { %v838_v33 = vpop.permute.xlu0 %837  ;;  %v840_v34 = vpop.permute.xlu1 %839 }
 0x29f   : > { %855 = vst.msk [vmem:[%s1793_s18 + $0x33] sm:$0x1] %vm707_vm2, %v838_v33  ;;  %856 = vst.msk [vmem:[%s1793_s18 + $0x3b] sm:$0x1] %vm707_vm2, %v840_v34 }
 0x2a2   : > { %v884_v35 = vpop.permute.xlu0 %883  ;;  %v886_v36 = vpop.permute.xlu1 %885 }
 0x2a3   : > { %901 = vst.msk [vmem:[%s1793_s18 + $0x34] sm:$0x1] %vm707_vm2, %v884_v35  ;;  %902 = vst.msk [vmem:[%s1793_s18 + $0x3c] sm:$0x1] %vm707_vm2, %v886_v36 }
 0x2a6   : > { %v930_v37 = vpop.permute.xlu0 %929  ;;  %v932_v38 = vpop.permute.xlu1 %931 }
 0x2a7   : > { %947 = vst.msk [vmem:[%s1793_s18 + $0x35] sm:$0x1] %vm707_vm2, %v930_v37  ;;  %948 = vst.msk [vmem:[%s1793_s18 + $0x3d] sm:$0x1] %vm707_vm2, %v932_v38 }
 0x2a8   : > { %1052 = vadd.xlane.f32.xlu0 %v1844_v40 }
 0x2a9   : > { %1045 = vadd.xlane.f32.xlu1 %v1777_v13 }
 0x2aa   : > { %v976_v39 = vpop.permute.xlu0 %975  ;;  %v978_v41 = vpop.permute.xlu1 %977 }
 0x2ab   : > { %993 = vst.msk [vmem:[%s1793_s18 + $0x36] sm:$0x1] %vm707_vm2, %v976_v39  ;;  %994 = vst.msk [vmem:[%s1793_s18 + $0x3e] sm:$0x1] %vm707_vm2, %v978_v41 }
 0x2ba   : > { %1017 = vrot.lane.b32.xlu1 %v1717_v9, %s1478_s30 }
 0x2be   : > { %1015 = vrot.lane.b32.xlu0 %v1711_v8, %s1478_s30  ;;  %1019 = vrot.lane.b32.xlu1 %v1719_v10, %s1478_s30 }
 0x2c2   : > { %1021 = vrot.lane.b32.xlu0 %v1666_v63, %s1478_s30  ;;  %1023 = vrot.lane.b32.xlu1 %v1668_v1, %s1478_s30  ;;  %s1077_s30 = scalar_lea.vmem (%p1560_p5), %s2037_s4, %s1322_s29 }
 0x2e4   : > { %v1000_v13 = vpop.xlane.xlu0 %999 }
 0x2e8   : > { %v731_v40 = vpop.xlane.xlu0 %730 }
 0x2e9   : > { %v722_v42 = vpop.xlane.xlu1 %721 }
 0x2ec   : > { %v777_v43 = vpop.xlane.xlu0 %776 }
 0x2ed   : > { %v770_v44 = vpop.xlane.xlu1 %769  ;;  %v778_v58 = vadd.f32 %v777_v43, %v731_v40 }
 0x2ee   : > { %v771_v47 = vadd.f32 %v770_v44, %v722_v42 }
 0x2f0   : > { %v823_v45 = vpop.xlane.xlu0 %822 }
 0x2f1   : > { %v816_v9 = vpop.xlane.xlu1 %815  ;;  %v824_v59 = vadd.f32 %v823_v45, %v778_v58 }
 0x2f2   : > { %v817_v10 = vadd.f32 %v816_v9, %v771_v47 }
 0x2f4   : > { %v869_v46 = vpop.xlane.xlu0 %868 }
 0x2f5   : > { %v862_v8 = vpop.xlane.xlu1 %861  ;;  %v870_v61 = vadd.f32 %v869_v46, %v824_v59 }
 0x2f6   : > { %v863_v49 = vadd.f32 %v862_v8, %v817_v10 }
 0x2f8   : > { %v915_v48 = vpop.xlane.xlu0 %914 }
 0x2f9   : > { %v908_v63 = vpop.xlane.xlu1 %907  ;;  %v916_v62 = vadd.f32 %v915_v48, %v870_v61 }
 0x2fa   : > { %v909_v1 = vadd.f32 %v908_v63, %v863_v49 }
 0x2fc   : > { %v961_v50 = vpop.xlane.xlu0 %960 }
 0x2fd   : > { %v954_v51 = vpop.xlane.xlu1 %953  ;;  %v962_v0 = vadd.f32 %v961_v50, %v916_v62 }
 0x2fe   : > { %v955_v52 = vadd.f32 %v954_v51, %v909_v1 }
 0x300   : > { %v1010_v53 = vpop.permute.xlu0 %1009  ;;  %v1001_v54 = vadd.f32 %v1000_v13, %v955_v52 }
 0x301   : > { %1033 = vst.msk [vmem:[%s1793_s18 + $0x7] sm:$0x1] %vm707_vm2, %v1010_v53  ;;  %v1007_v55 = vpop.xlane.xlu1 %1006 }
 0x302   : > { %v1008_v2 = vadd.f32 %v1007_v55, %v962_v0 }
 0x304   : > { %v1014_v56 = vpop.permute.xlu0 %1013 }
 0x305   : > { %1035 = vst.msk [vmem:[%s1793_s18 + $0x17] sm:$0x1] %vm707_vm2, %v1014_v56  ;;  %v1012_v57 = vpop.permute.xlu1 %1011 }
 0x306   : > { %1034 = vst.msk [vmem:[%s1793_s18 + $0xf] sm:$0x1] %vm707_vm2, %v1012_v57 }
 0x308   : > { %v1119_v20 = vld [vmem:[%s1793_s18] sm:$0xff] (%p1560_p5) }
 0x309   : > { %1120 = vst [vmem:[%s1077_s30] sm:$0xff] (%p1560_p5), %v1119_v20 }
 0x30c   : > { %v1123_v21 = vld [vmem:[%s1793_s18 + $0x10] sm:$0xff] (%p1560_p5) }
 0x30d   : > { %v1121_v15 = vld [vmem:[%s1793_s18 + $0x8] sm:$0xff] (%p1560_p5)  ;;  %1124 = vst [vmem:[%s1077_s30 + $0x80] sm:$0xff] (%p1560_p5), %v1123_v21 }
 0x30e   : > { %1122 = vst [vmem:[%s1077_s30 + $0x40] sm:$0xff] (%p1560_p5), %v1121_v15 }
 0x335   : > { %v1053_v3 = vpop.xlane.xlu0 %1052 }
 0x336   : > { %v1054_v5 = vadd.f32 %v1053_v3, %v1008_v2  ;;  %v1046_v7 = vpop.xlane.xlu1 %1045 }
 0x337   : > { %v1047_v11 = vadd.f32 %v1046_v7, %v1001_v54 }
 0x339   : > { %v1056_v12 = vsel %vm1055_vm3, %v1047_v11, %v1054_v5  ;;  %v1016_v14 = vpop.permute.xlu0 %1015 }
 0x33a   : > { %1058 = vst.msk [vmem:[%s349_s22] sm:$0xff] %vm1057_vm4, %v1056_v12  ;;  %v1018_v16 = vpop.permute.xlu1 %1017 }
 0x33b   : > { %1036 = vst.msk [vmem:[%s1793_s18 + $0x1f] sm:$0x1] %vm707_vm2, %v1016_v14  ;;  %1037 = vst.msk [vmem:[%s1793_s18 + $0x27] sm:$0x1] %vm707_vm2, %v1018_v16 }
 0x33d   : > { %v1022_v17 = vpop.permute.xlu0 %1021  ;;  %1073 = sbr.rel (!%p1560_p5) target bundleno = 844 (0x34c), region = 40 }
 0x33e   : > { %1039 = vst.msk [vmem:[%s1793_s18 + $0x37] sm:$0x1] %vm707_vm2, %v1022_v17  ;;  %v1020_v18 = vpop.permute.xlu1 %1019 }
 0x33f   : > { %1038 = vst.msk [vmem:[%s1793_s18 + $0x2f] sm:$0x1] %vm707_vm2, %v1020_v18 }
 0x342   : > { %v1024_v19 = vpop.permute.xlu1 %1023  ;;  %v1125_v22 = vld [vmem:[%s1793_s18 + $0x18] sm:$0xff] (%p1560_p5)  ;;  %v1127_v23 = vld [vmem:[%s1793_s18 + $0x20] sm:$0xff] (%p1560_p5) }
 0x343   : > { %1040 = vst.msk [vmem:[%s1793_s18 + $0x3f] sm:$0x1] %vm707_vm2, %v1024_v19  ;;  %1126 = vst [vmem:[%s1077_s30 + $0xc0] sm:$0xff] (%p1560_p5), %v1125_v22 }
 0x344   : > { %1128 = vst [vmem:[%s1077_s30 + $0x100] sm:$0xff] %v1127_v23 }
 0x345   : > { %v1131_v25 = vld [vmem:[%s1793_s18 + $0x30] sm:$0xff] }
 0x346   : > { %v1129_v24 = vld [vmem:[%s1793_s18 + $0x28] sm:$0xff]  ;;  %1132 = vst [vmem:[%s1077_s30 + $0x180] sm:$0xff] %v1131_v25 }
 0x347   : > { %1130 = vst [vmem:[%s1077_s30 + $0x140] sm:$0xff] %v1129_v24 }
 0x34a   : > { %v1133_v26 = vld [vmem:[%s1793_s18 + $0x38] sm:$0xff] }
 0x34b   : > { %1134 = vst [vmem:[%s1077_s30 + $0x1c0] sm:$0xff] %v1133_v26 }
 0x34c PF: > { %s16_s24 = sadd.s32 1, %s1466_s24   ;;  %s2059_s20 = sld [smem:[#allocation3_spill]] }
 0x34d   : > { %p13_p0 = scmp.ge.s32.totalorder %s16_s24, 18   ;;  %s2060_s21 = sld [smem:[#allocation4_spill]] }
 0x34e   : > { %s2061_s22 = sld [smem:[#allocation5_spill]]  ;;  %s2062_s23 = sld [smem:[#allocation6_spill]] }
 0x34f   : > { %s2063_s18 = smov %s1446_s19  ;;  %s2064_s19 = smov %s1571_s8 }
 0x350   :  { %15 = sbr.rel (!%p13_p0) target bundleno = 6 (0x6), region = 124 }

</bundles_post_ra>
